<compile_context>
chip_gen: v5e
topology: v5e:2x2
jax: 0.10.0
libtpu: 0.0.40
codegen_flags: <defaults>
</compile_context>

<pallas_src>
import numpy as np
import jax
import jax.numpy as jnp
from jax.experimental import pallas as pl
from jax.experimental.pallas import tpu as pltpu

# ----------------------------- configuration --------------------------------
SA_TYPE = 0
N = 2            # batch
C_IN = 8         # in_planes (== Bottleneck out_planes, residual add)
REL = 2          # rel_planes
MID = 8          # mid_planes (SAM out_planes)
SHARE = 4        # share_planes
K = 3            # kernel_size
STRIDE = 1
DIL = 1
H = W = 8
HW = H * W
NHW = N * HW                     # batch fused into lanes -> 128 (one full lane tile)
KK = K * K
KNHW = KK * NHW
CW = MID // SHARE                # conv_w output channels
PAD = (DIL * (K - 1) + 1) // 2   # reflect pad, == K // 2 for dilation 1

HIGH = dict(precision=jax.lax.Precision.HIGHEST, preferred_element_type=jnp.float32)


# ------------------- reflect-pad neighbourhood index maps -------------------
def _reflect(i, n):
    if i < 0:
        return -i
    if i >= n:
        return 2 * n - 2 - i
    return i


def build_neighbors():
    """nbr[k, i] = flat index of the k-th reflect-padded neighbour of pixel i."""
    nbr = np.zeros((KK, HW), np.int32)
    for kh in range(K):
        for kw in range(K):
            k = kh * K + kw
            for h in range(H):
                for w in range(W):
                    hn = _reflect(h * STRIDE - PAD + kh * DIL, H)
                    wn = _reflect(w * STRIDE - PAD + kw * DIL, W)
                    nbr[k, h * W + w] = hn * W + wn
    return nbr


def build_gather_matrix(nbr):
    """S[j, k*NHW + n*HW + i] = 1 iff j == n*HW + nbr[k, i].
       (X @ S) gathers every K*K neighbourhood for every (batch, pixel) at once."""
    S = np.zeros((NHW, KNHW), np.float32)
    for k in range(KK):
        for n in range(N):
            for i in range(HW):
                S[n * HW + nbr[k, i], k * NHW + n * HW + i] = 1.0
    return S


def build_position():
    """position(H, W) from the reference: channel 0 = loc_w, channel 1 = loc_h."""
    loc_w = np.tile(np.linspace(-1.0, 1.0, W, dtype=np.float32)[None, :], (H, 1))
    loc_h = np.tile(np.linspace(-1.0, 1.0, H, dtype=np.float32)[:, None], (1, W))
    return np.stack([loc_w, loc_h], 0).reshape(2, HW)


# ------------------------------ parameters ----------------------------------
def bn_fold(key, c):
    """Inference-mode BatchNorm folded to per-channel (scale, shift)."""
    kg, kb, km, kv = jax.random.split(key, 4)
    gamma = 1.0 + 0.1 * jax.random.normal(kg, (c,))
    beta = 0.1 * jax.random.normal(kb, (c,))
    mean = 0.1 * jax.random.normal(km, (c,))
    var = 1.0 + 0.1 * jax.random.uniform(kv, (c,))
    scale = gamma / jnp.sqrt(var + 1e-5)
    shift = beta - mean * scale
    return (scale.reshape(c, 1).astype(jnp.float32),
            shift.reshape(c, 1).astype(jnp.float32))


def make_params(key):
    ks = jax.random.split(key, 16)

    def wgt(k, shape, scale=0.3):
        return (scale * jax.random.normal(k, shape)).astype(jnp.float32)

    s1, b1 = bn_fold(ks[0], C_IN)                                # bn1
    W1, c1b = wgt(ks[1], (REL, C_IN)), wgt(ks[2], (REL, 1))      # sam.conv1
    W2, c2b = wgt(ks[3], (REL, C_IN)), wgt(ks[4], (REL, 1))      # sam.conv2
    W3, c3b = wgt(ks[5], (MID, C_IN)), wgt(ks[6], (MID, 1))      # sam.conv3
    Wp, bp = wgt(ks[7], (2, 2)), wgt(ks[8], (2, 1))              # sam.conv_p
    sw1, bw1 = bn_fold(ks[9], REL + 2)                           # conv_w BN #1
    Wc1 = wgt(ks[10], (REL, REL + 2))                            # conv_w conv #1 (no bias)
    sw2, bw2 = bn_fold(ks[11], REL)                              # conv_w BN #2
    Wc2, bc2 = wgt(ks[12], (CW, REL)), wgt(ks[13], (CW, 1))      # conv_w conv #2
    s2, b2s = bn_fold(ks[14], MID)                               # bn2
    Wf = wgt(ks[15], (C_IN, MID))                                # final conv
    bf = 0.1 * jnp.ones((C_IN, 1), jnp.float32)
    return (s1, b1, W1, c1b, W2, c2b, W3, c3b, Wp, bp,
            sw1, bw1, Wc1, sw2, bw2, Wc2, bc2, s2, b2s, Wf, bf)


def pack_params(raw, pos, nbr):
    """Fold BNs / biases into weights and precompute the position branch."""
    (s1, b1, W1, c1b, W2, c2b, W3, c3b, Wp, bp,
     sw1, bw1, Wc1, sw2, bw2, Wc2, bc2, s2, b2s, Wf, bf) = raw

    # fused conv3 / conv2 / conv1, rows [x3 | x2' | x1'].  conv_w BN#1 scale is
    # folded into the x1/x2 rows; their biases are folded into `beta` below.
    W123 = jnp.concatenate([W3, sw1[:REL] * W2, sw1[:REL] * W1], axis=0)   # (12, C_IN)

    # per-channel scale/shift columns; conv3 bias folded through the softmax
    # (weights sum to 1 over K*K) into the bn2 shift.
    b2p = s2 * c3b + b2s
    vec8 = jnp.concatenate([s1, b1, s2, b2p, bf], axis=1)                  # (C_IN, 5)

    # input-independent position branch: conv_p + Subtraction + BN/ReLU + the
    # position half of conv_w's first conv, with conv_w BN#2 folded in; tiled over
    # the fused batch -> (REL, KK, NHW).
    p = jnp.dot(Wp, pos, **HIGH) + bp                                      # (2, HW)
    pd = jnp.stack([p - p[:, nbr[k]] for k in range(KK)], axis=1)          # (2, KK, HW)
    tpos = jnp.maximum(pd * sw1[REL:][:, :, None] + bw1[REL:][:, :, None], 0.0)
    posA = jnp.einsum('or,rki->oki', Wc1[:, REL:], tpos, **HIGH)           # (2, KK, HW)
    pos_pack = sw2[:, :, None] * posA + bw2[:, :, None]
    pos_pack = jnp.tile(pos_pack, (1, 1, N)).astype(jnp.float32)           # (REL, KK, NHW)

    # SMEM scalars: folded subtraction-branch BN shift (+ conv1/conv2 biases), the
    # BN#2-scaled 2x2 conv_w map, and the final 2x2 conv_w map (bias dropped: it is
    # constant over K*K and cancels in the softmax).
    beta = (sw1[:REL] * (c1b - c2b) + bw1[:REL]).reshape(-1)               # (2,)
    A = (sw2 * Wc1[:, :REL]).reshape(-1)                                   # (4,)
    scal = jnp.concatenate([beta, A, Wc2.reshape(-1)]).astype(jnp.float32)  # (10,)

    return [W123.astype(jnp.float32), Wf.astype(jnp.float32),
            vec8.astype(jnp.float32), pos_pack, scal]


# ------------------------------ Pallas kernel --------------------------------
def bottleneck_kernel(x_ref, S_ref, W123_ref, Wf_ref, vec8_ref, pos_ref, scal_ref,
                      out_ref):
    f32 = jnp.float32

    x = x_ref[...]                                    # (C_IN, NHW)
    s1 = vec8_ref[:, 0:1]
    b1 = vec8_ref[:, 1:2]
    s2 = vec8_ref[:, 2:3]
    b2 = vec8_ref[:, 3:4]
    bf = vec8_ref[:, 4:5]

    beta0 = scal_ref[0]
    beta1 = scal_ref[1]
    a00 = scal_ref[2]
    a01 = scal_ref[3]
    a10 = scal_ref[4]
    a11 = scal_ref[5]
    c00 = scal_ref[6]
    c01 = scal_ref[7]
    c10 = scal_ref[8]
    c11 = scal_ref[9]

    # out = relu(bn1(x))
    y = jnp.maximum(x * s1 + b1, 0.0)

    # fused conv3 / conv2 / conv1, rows [x3 (MID) | x2' (REL) | x1' (REL)]
    qkv = jax.lax.dot(W123_ref[...], y, preferred_element_type=f32)        # (12, NHW)
    x1p = qkv[MID + REL:MID + 2 * REL]                                     # (REL, NHW)

    # exact K*K neighbourhood gather of [x3 | x2'] via one wide 0/1 matmul
    # (hi/lo bf16 split keeps the gathered values f32-exact).
    x23 = qkv[0:MID + REL]                                                 # (10, NHW)
    hi = x23.astype(jnp.bfloat16)
    lo = (x23 - hi.astype(f32)).astype(jnp.bfloat16)
    g = (jax.lax.dot(hi, S_ref[...], preferred_element_type=f32) +
         jax.lax.dot(lo, S_ref[...], preferred_element_type=f32))          # (10, KK*NHW)

    # repack gathered x2' channels sublane-dense: (KK, NHW) = (9, 128) per channel
    x2g0 = jnp.concatenate(
        [g[MID:MID + 1, k * NHW:(k + 1) * NHW] for k in range(KK)], axis=0)
    x2g1 = jnp.concatenate(
        [g[MID + 1:MID + 2, k * NHW:(k + 1) * NHW] for k in range(KK)], axis=0)

    # conv_w chain on dense (KK, NHW) tiles:
    #   Subtraction2 + BN#1/ReLU (scale folded, shift = beta),
    #   2x2 conv + precomputed position term (BN#2 folded), ReLU,
    #   2x2 conv (bias dropped: softmax-invariant).
    t0 = jnp.maximum(x1p[0:1, :] - x2g0 + beta0, 0.0)                      # (KK, NHW)
    t1 = jnp.maximum(x1p[1:2, :] - x2g1 + beta1, 0.0)
    u0 = jnp.maximum(a00 * t0 + a01 * t1 + pos_ref[0], 0.0)
    u1 = jnp.maximum(a10 * t0 + a11 * t1 + pos_ref[1], 0.0)
    l0 = c00 * u0 + c01 * u1
    l1 = c10 * u0 + c11 * u1

    # softmax over the K*K (sublane) axis
    e0 = jnp.exp(l0 - jnp.max(l0, axis=0, keepdims=True))
    e1 = jnp.exp(l1 - jnp.max(l1, axis=0, keepdims=True))
    inv0 = pl.reciprocal(jnp.sum(e0, axis=0, keepdims=True), approx=True)  # (1, NHW)
    inv1 = pl.reciprocal(jnp.sum(e1, axis=0, keepdims=True), approx=True)

    # Aggregation: output channel c uses softmax channel c // SHARE; weight rows
    # broadcast over each SHARE group via implicit (1, NHW) sublane broadcasting.
    x3_lo = g[0:SHARE]                     # channels 0..3, lane-split (SHARE, KK*NHW)
    x3_hi = g[SHARE:MID]                   # channels 4..7
    acc_lo = e0[0:1, :] * x3_lo[:, 0:NHW]
    acc_hi = e1[0:1, :] * x3_hi[:, 0:NHW]
    for k in range(1, KK):
        acc_lo = acc_lo + e0[k:k + 1, :] * x3_lo[:, k * NHW:(k + 1) * NHW]
        acc_hi = acc_hi + e1[k:k + 1, :] * x3_hi[:, k * NHW:(k + 1) * NHW]
    agg = jnp.concatenate([acc_lo * inv0, acc_hi * inv1], axis=0)          # (MID, NHW)

    # relu(bn2(.)) (conv3 bias pre-folded into b2), final 1x1 conv, residual add
    z = jnp.maximum(agg * s2 + b2, 0.0)
    out_ref[...] = jax.lax.dot(Wf_ref[...], z, preferred_element_type=f32) + bf + x


def bottleneck_forward(x_nchw, S_bf16, packed):
    # fuse batch into the lane axis: (N, C, H, W) -> (C, N*HW)
    x_fused = x_nchw.reshape(N, C_IN, HW).transpose(1, 0, 2).reshape(C_IN, NHW)
    W123, Wf, vec8, pos_pack, scal = packed
    inputs = [x_fused, S_bf16, W123, Wf, vec8, pos_pack, scal]

    vmem = pltpu.MemorySpace.VMEM
    smem = pltpu.MemorySpace.SMEM
    in_specs = ([pl.BlockSpec(memory_space=vmem)] * 6 +
                [pl.BlockSpec(memory_space=smem)])

    out_fused = pl.pallas_call(
        bottleneck_kernel,
        out_shape=jax.ShapeDtypeStruct((C_IN, NHW), jnp.float32),
        in_specs=in_specs,
        out_specs=pl.BlockSpec(memory_space=vmem),
    )(*inputs)
    return out_fused.reshape(C_IN, N, HW).transpose(1, 0, 2).reshape(N, C_IN, H, W)


# ------------------------- pure-JAX reference (check) ------------------------
def ref_forward(x_nchw, pos, nbr, raw):
    (s1, b1, W1, c1b, W2, c2b, W3, c3b, Wp, bp,
     sw1, bw1, Wc1, sw2, bw2, Wc2, bc2, s2, b2s, Wf, bf) = raw

    x = x_nchw.reshape(N, C_IN, HW)
    y = jnp.maximum(x * s1[None] + b1[None], 0.0)
    x1 = jnp.einsum('rc,nci->nri', W1, y, **HIGH) + c1b[None]
    x2 = jnp.einsum('rc,nci->nri', W2, y, **HIGH) + c2b[None]
    x3 = jnp.einsum('mc,nci->nmi', W3, y, **HIGH) + c3b[None]
    p = jnp.dot(Wp, pos, **HIGH) + bp

    logits = []
    for k in range(KK):
        idx = nbr[k]
        diff = x1 - x2[:, :, idx]
        pdiff = jnp.broadcast_to((p - p[:, idx])[None], (N, 2, HW))
        f = jnp.concatenate([diff, pdiff], axis=1)
        t = jnp.maximum(f * sw1[None] + bw1[None], 0.0)
        u = jnp.einsum('or,nri->noi', Wc1, t, **HIGH)
        u = jnp.maximum(u * sw2[None] + bw2[None], 0.0)
        logits.append(jnp.einsum('or,nri->noi', Wc2, u, **HIGH) + bc2[None])

    L = jnp.stack(logits, axis=2)                          # (N, CW, KK, HW)
    A = jax.nn.softmax(L, axis=2)
    agg = jnp.zeros((N, MID, HW), jnp.float32)
    for k in range(KK):
        wfull = jnp.repeat(A[:, :, k, :], SHARE, axis=1)   # channel c -> weight c // SHARE
        agg = agg + wfull * x3[:, :, nbr[k]]

    z = jnp.maximum(agg * s2[None] + b2s[None], 0.0)
    o = jnp.einsum('om,nmi->noi', Wf, z, **HIGH) + bf[None]
    return (o + x).reshape(N, C_IN, H, W)


# ----------------------------------- main ------------------------------------
if __name__ == "__main__":
    key = jax.random.PRNGKey(0)
    kx, kp = jax.random.split(key)

    x = jax.random.normal(kx, (N, C_IN, H, W), jnp.float32)   # NCHW, like PyTorch
    raw = make_params(kp)
    nbr = build_neighbors()
    pos = jnp.asarray(build_position())
    S_bf16 = jnp.asarray(build_gather_matrix(nbr)).astype(jnp.bfloat16)
    packed = pack_params(raw, pos, nbr)

    out = jax.block_until_ready(bottleneck_forward(x, S_bf16, packed))
    assert out.shape == (N, C_IN, H, W)

    ref = ref_forward(x, pos, nbr, raw)
    if not np.allclose(np.asarray(out), np.asarray(ref), atol=5e-2, rtol=5e-2):
        err = float(np.max(np.abs(np.asarray(out) - np.asarray(ref))))
        raise AssertionError(
            f"Pallas kernel output does not match JAX reference (max err {err})")

    print("KERNEL_OK")
</pallas_src>

<mosaic_0001>
module attributes {stable_mosaic.version = 11 : i64} {
  func.func @bottleneck_kernel(%arg0: memref<8x128xf32, #tpu.memory_space<vmem>>, %arg1: memref<128x1152xbf16, #tpu.memory_space<vmem>>, %arg2: memref<12x8xf32, #tpu.memory_space<vmem>>, %arg3: memref<8x8xf32, #tpu.memory_space<vmem>>, %arg4: memref<8x5xf32, #tpu.memory_space<vmem>>, %arg5: memref<2x9x128xf32, #tpu.memory_space<vmem>>, %arg6: memref<10xf32, #tpu.memory_space<smem>>, %arg7: memref<8x128xf32, #tpu.memory_space<vmem>>) attributes {dimension_semantics = [], scalar_prefetch = 0 : i64, scratch_operands = 0 : i64, tpu.core_type = #tpu.core_type<tc>} {
    %c0 = arith.constant 0 : index
    %c0_0 = arith.constant 0 : index
    %0 = vector.load %arg0[%c0, %c0_0] : memref<8x128xf32, #tpu.memory_space<vmem>>, vector<8x128xf32>
    %c0_1 = arith.constant 0 : index
    %c0_2 = arith.constant 0 : index
    %1 = vector.load %arg4[%c0_1, %c0_2] : memref<8x5xf32, #tpu.memory_space<vmem>>, vector<8x1xf32>
    %c0_3 = arith.constant 0 : index
    %c1 = arith.constant 1 : index
    %2 = vector.load %arg4[%c0_3, %c1] : memref<8x5xf32, #tpu.memory_space<vmem>>, vector<8x1xf32>
    %c0_4 = arith.constant 0 : index
    %c2 = arith.constant 2 : index
    %3 = vector.load %arg4[%c0_4, %c2] : memref<8x5xf32, #tpu.memory_space<vmem>>, vector<8x1xf32>
    %c0_5 = arith.constant 0 : index
    %c3 = arith.constant 3 : index
    %4 = vector.load %arg4[%c0_5, %c3] : memref<8x5xf32, #tpu.memory_space<vmem>>, vector<8x1xf32>
    %c0_6 = arith.constant 0 : index
    %c4 = arith.constant 4 : index
    %5 = vector.load %arg4[%c0_6, %c4] : memref<8x5xf32, #tpu.memory_space<vmem>>, vector<8x1xf32>
    %c0_7 = arith.constant 0 : index
    %6 = memref.load %arg6[%c0_7] : memref<10xf32, #tpu.memory_space<smem>>
    %c1_8 = arith.constant 1 : index
    %7 = memref.load %arg6[%c1_8] : memref<10xf32, #tpu.memory_space<smem>>
    %c2_9 = arith.constant 2 : index
    %8 = memref.load %arg6[%c2_9] : memref<10xf32, #tpu.memory_space<smem>>
    %c3_10 = arith.constant 3 : index
    %9 = memref.load %arg6[%c3_10] : memref<10xf32, #tpu.memory_space<smem>>
    %c4_11 = arith.constant 4 : index
    %10 = memref.load %arg6[%c4_11] : memref<10xf32, #tpu.memory_space<smem>>
    %c5 = arith.constant 5 : index
    %11 = memref.load %arg6[%c5] : memref<10xf32, #tpu.memory_space<smem>>
    %c6 = arith.constant 6 : index
    %12 = memref.load %arg6[%c6] : memref<10xf32, #tpu.memory_space<smem>>
    %c7 = arith.constant 7 : index
    %13 = memref.load %arg6[%c7] : memref<10xf32, #tpu.memory_space<smem>>
    %c8 = arith.constant 8 : index
    %14 = memref.load %arg6[%c8] : memref<10xf32, #tpu.memory_space<smem>>
    %c9 = arith.constant 9 : index
    %15 = memref.load %arg6[%c9] : memref<10xf32, #tpu.memory_space<smem>>
    %16 = vector.broadcast %1 : vector<8x1xf32> to vector<8x128xf32>
    %17 = arith.mulf %0, %16 : vector<8x128xf32>
    %18 = vector.broadcast %2 : vector<8x1xf32> to vector<8x128xf32>
    %19 = arith.addf %17, %18 : vector<8x128xf32>
    %cst = arith.constant 0.000000e+00 : f32
    %20 = vector.broadcast %cst : f32 to vector<8x128xf32>
    %21 = arith.maximumf %19, %20 : vector<8x128xf32>
    %c0_12 = arith.constant 0 : index
    %c0_13 = arith.constant 0 : index
    %22 = vector.load %arg2[%c0_12, %c0_13] : memref<12x8xf32, #tpu.memory_space<vmem>>, vector<12x8xf32>
    %cst_14 = arith.constant dense<0.000000e+00> : vector<12x128xf32>
    %23 = tpu.matmul %22, %21, %cst_14 {dimension_numbers = #tpu.dot_dimension_numbers<[1], [0], [0], [1], [0, 0, 1, 1], [], []>} : vector<12x8xf32>, vector<8x128xf32>, vector<12x128xf32> -> vector<12x128xf32>
    %24 = vector.extract_strided_slice %23 {offsets = [10, 0], sizes = [2, 128], strides = [1, 1]} : vector<12x128xf32> to vector<2x128xf32>
    %25 = vector.extract_strided_slice %23 {offsets = [0, 0], sizes = [10, 128], strides = [1, 1]} : vector<12x128xf32> to vector<10x128xf32>
    %26 = arith.truncf %25 : vector<10x128xf32> to vector<10x128xbf16>
    %27 = arith.extf %26 : vector<10x128xbf16> to vector<10x128xf32>
    %28 = arith.subf %25, %27 : vector<10x128xf32>
    %29 = arith.truncf %28 : vector<10x128xf32> to vector<10x128xbf16>
    %c0_15 = arith.constant 0 : index
    %c0_16 = arith.constant 0 : index
    %30 = vector.load %arg1[%c0_15, %c0_16] : memref<128x1152xbf16, #tpu.memory_space<vmem>>, vector<128x1152xbf16>
    %cst_17 = arith.constant dense<0.000000e+00> : vector<10x1152xf32>
    %31 = tpu.matmul %26, %30, %cst_17 {dimension_numbers = #tpu.dot_dimension_numbers<[1], [0], [0], [1], [0, 0, 1, 1], [], []>} : vector<10x128xbf16>, vector<128x1152xbf16>, vector<10x1152xf32> -> vector<10x1152xf32>
    %c0_18 = arith.constant 0 : index
    %c0_19 = arith.constant 0 : index
    %32 = vector.load %arg1[%c0_18, %c0_19] : memref<128x1152xbf16, #tpu.memory_space<vmem>>, vector<128x1152xbf16>
    %cst_20 = arith.constant dense<0.000000e+00> : vector<10x1152xf32>
    %33 = tpu.matmul %29, %32, %cst_20 {dimension_numbers = #tpu.dot_dimension_numbers<[1], [0], [0], [1], [0, 0, 1, 1], [], []>} : vector<10x128xbf16>, vector<128x1152xbf16>, vector<10x1152xf32> -> vector<10x1152xf32>
    %34 = arith.addf %31, %33 : vector<10x1152xf32>
    %35 = vector.extract_strided_slice %34 {offsets = [8, 0], sizes = [1, 128], strides = [1, 1]} : vector<10x1152xf32> to vector<1x128xf32>
    %36 = vector.extract_strided_slice %34 {offsets = [8, 128], sizes = [1, 128], strides = [1, 1]} : vector<10x1152xf32> to vector<1x128xf32>
    %37 = vector.extract_strided_slice %34 {offsets = [8, 256], sizes = [1, 128], strides = [1, 1]} : vector<10x1152xf32> to vector<1x128xf32>
    %38 = vector.extract_strided_slice %34 {offsets = [8, 384], sizes = [1, 128], strides = [1, 1]} : vector<10x1152xf32> to vector<1x128xf32>
    %39 = vector.extract_strided_slice %34 {offsets = [8, 512], sizes = [1, 128], strides = [1, 1]} : vector<10x1152xf32> to vector<1x128xf32>
    %40 = vector.extract_strided_slice %34 {offsets = [8, 640], sizes = [1, 128], strides = [1, 1]} : vector<10x1152xf32> to vector<1x128xf32>
    %41 = vector.extract_strided_slice %34 {offsets = [8, 768], sizes = [1, 128], strides = [1, 1]} : vector<10x1152xf32> to vector<1x128xf32>
    %42 = vector.extract_strided_slice %34 {offsets = [8, 896], sizes = [1, 128], strides = [1, 1]} : vector<10x1152xf32> to vector<1x128xf32>
    %43 = vector.extract_strided_slice %34 {offsets = [8, 1024], sizes = [1, 128], strides = [1, 1]} : vector<10x1152xf32> to vector<1x128xf32>
    %44 = tpu.concatenate %35, %36, %37, %38, %39, %40, %41, %42, %43 in 0 : vector<1x128xf32>, vector<1x128xf32>, vector<1x128xf32>, vector<1x128xf32>, vector<1x128xf32>, vector<1x128xf32>, vector<1x128xf32>, vector<1x128xf32>, vector<1x128xf32> -> vector<9x128xf32>
    %45 = vector.extract_strided_slice %34 {offsets = [9, 0], sizes = [1, 128], strides = [1, 1]} : vector<10x1152xf32> to vector<1x128xf32>
    %46 = vector.extract_strided_slice %34 {offsets = [9, 128], sizes = [1, 128], strides = [1, 1]} : vector<10x1152xf32> to vector<1x128xf32>
    %47 = vector.extract_strided_slice %34 {offsets = [9, 256], sizes = [1, 128], strides = [1, 1]} : vector<10x1152xf32> to vector<1x128xf32>
    %48 = vector.extract_strided_slice %34 {offsets = [9, 384], sizes = [1, 128], strides = [1, 1]} : vector<10x1152xf32> to vector<1x128xf32>
    %49 = vector.extract_strided_slice %34 {offsets = [9, 512], sizes = [1, 128], strides = [1, 1]} : vector<10x1152xf32> to vector<1x128xf32>
    %50 = vector.extract_strided_slice %34 {offsets = [9, 640], sizes = [1, 128], strides = [1, 1]} : vector<10x1152xf32> to vector<1x128xf32>
    %51 = vector.extract_strided_slice %34 {offsets = [9, 768], sizes = [1, 128], strides = [1, 1]} : vector<10x1152xf32> to vector<1x128xf32>
    %52 = vector.extract_strided_slice %34 {offsets = [9, 896], sizes = [1, 128], strides = [1, 1]} : vector<10x1152xf32> to vector<1x128xf32>
    %53 = vector.extract_strided_slice %34 {offsets = [9, 1024], sizes = [1, 128], strides = [1, 1]} : vector<10x1152xf32> to vector<1x128xf32>
    %54 = tpu.concatenate %45, %46, %47, %48, %49, %50, %51, %52, %53 in 0 : vector<1x128xf32>, vector<1x128xf32>, vector<1x128xf32>, vector<1x128xf32>, vector<1x128xf32>, vector<1x128xf32>, vector<1x128xf32>, vector<1x128xf32>, vector<1x128xf32> -> vector<9x128xf32>
    %55 = vector.extract_strided_slice %24 {offsets = [0, 0], sizes = [1, 128], strides = [1, 1]} : vector<2x128xf32> to vector<1x128xf32>
    %56 = vector.broadcast %55 : vector<1x128xf32> to vector<9x128xf32>
    %57 = arith.subf %56, %44 : vector<9x128xf32>
    %58 = vector.broadcast %6 : f32 to vector<9x128xf32>
    %59 = arith.addf %57, %58 : vector<9x128xf32>
    %cst_21 = arith.constant 0.000000e+00 : f32
    %60 = vector.broadcast %cst_21 : f32 to vector<9x128xf32>
    %61 = arith.maximumf %59, %60 : vector<9x128xf32>
    %62 = vector.extract_strided_slice %24 {offsets = [1, 0], sizes = [1, 128], strides = [1, 1]} : vector<2x128xf32> to vector<1x128xf32>
    %63 = vector.broadcast %62 : vector<1x128xf32> to vector<9x128xf32>
    %64 = arith.subf %63, %54 : vector<9x128xf32>
    %65 = vector.broadcast %7 : f32 to vector<9x128xf32>
    %66 = arith.addf %64, %65 : vector<9x128xf32>
    %cst_22 = arith.constant 0.000000e+00 : f32
    %67 = vector.broadcast %cst_22 : f32 to vector<9x128xf32>
    %68 = arith.maximumf %66, %67 : vector<9x128xf32>
    %69 = vector.broadcast %8 : f32 to vector<9x128xf32>
    %70 = arith.mulf %69, %61 : vector<9x128xf32>
    %71 = vector.broadcast %9 : f32 to vector<9x128xf32>
    %72 = arith.mulf %71, %68 : vector<9x128xf32>
    %73 = arith.addf %70, %72 : vector<9x128xf32>
    %c0_23 = arith.constant 0 : index
    %c0_24 = arith.constant 0 : index
    %c0_25 = arith.constant 0 : index
    %74 = vector.load %arg5[%c0_23, %c0_24, %c0_25] : memref<2x9x128xf32, #tpu.memory_space<vmem>>, vector<1x9x128xf32>
    %75 = vector.shape_cast %74 : vector<1x9x128xf32> to vector<9x128xf32>
    %76 = arith.addf %73, %75 : vector<9x128xf32>
    %cst_26 = arith.constant 0.000000e+00 : f32
    %77 = vector.broadcast %cst_26 : f32 to vector<9x128xf32>
    %78 = arith.maximumf %76, %77 : vector<9x128xf32>
    %79 = vector.broadcast %10 : f32 to vector<9x128xf32>
    %80 = arith.mulf %79, %61 : vector<9x128xf32>
    %81 = vector.broadcast %11 : f32 to vector<9x128xf32>
    %82 = arith.mulf %81, %68 : vector<9x128xf32>
    %83 = arith.addf %80, %82 : vector<9x128xf32>
    %c1_27 = arith.constant 1 : index
    %c0_28 = arith.constant 0 : index
    %c0_29 = arith.constant 0 : index
    %84 = vector.load %arg5[%c1_27, %c0_28, %c0_29] : memref<2x9x128xf32, #tpu.memory_space<vmem>>, vector<1x9x128xf32>
    %85 = vector.shape_cast %84 : vector<1x9x128xf32> to vector<9x128xf32>
    %86 = arith.addf %83, %85 : vector<9x128xf32>
    %cst_30 = arith.constant 0.000000e+00 : f32
    %87 = vector.broadcast %cst_30 : f32 to vector<9x128xf32>
    %88 = arith.maximumf %86, %87 : vector<9x128xf32>
    %89 = vector.broadcast %12 : f32 to vector<9x128xf32>
    %90 = arith.mulf %89, %78 : vector<9x128xf32>
    %91 = vector.broadcast %13 : f32 to vector<9x128xf32>
    %92 = arith.mulf %91, %88 : vector<9x128xf32>
    %93 = arith.addf %90, %92 : vector<9x128xf32>
    %94 = vector.broadcast %14 : f32 to vector<9x128xf32>
    %95 = arith.mulf %94, %78 : vector<9x128xf32>
    %96 = vector.broadcast %15 : f32 to vector<9x128xf32>
    %97 = arith.mulf %96, %88 : vector<9x128xf32>
    %98 = arith.addf %95, %97 : vector<9x128xf32>
    %cst_31 = arith.constant dense<0xFF800000> : vector<128xf32>
    %99 = vector.multi_reduction <maximumf>, %93, %cst_31 [0] : vector<9x128xf32> to vector<128xf32>
    %100 = vector.shape_cast %99 : vector<128xf32> to vector<1x128xf32>
    %101 = vector.broadcast %100 : vector<1x128xf32> to vector<9x128xf32>
    %102 = arith.subf %93, %101 : vector<9x128xf32>
    %103 = math.exp %102 : vector<9x128xf32>
    %cst_32 = arith.constant dense<0xFF800000> : vector<128xf32>
    %104 = vector.multi_reduction <maximumf>, %98, %cst_32 [0] : vector<9x128xf32> to vector<128xf32>
    %105 = vector.shape_cast %104 : vector<128xf32> to vector<1x128xf32>
    %106 = vector.broadcast %105 : vector<1x128xf32> to vector<9x128xf32>
    %107 = arith.subf %98, %106 : vector<9x128xf32>
    %108 = math.exp %107 : vector<9x128xf32>
    %cst_33 = arith.constant dense<0.000000e+00> : vector<128xf32>
    %109 = vector.multi_reduction <add>, %103, %cst_33 [0] : vector<9x128xf32> to vector<128xf32>
    %110 = vector.shape_cast %109 : vector<128xf32> to vector<1x128xf32>
    %111 = tpu.reciprocal %110 {approx = true} : vector<1x128xf32> -> vector<1x128xf32>
    %cst_34 = arith.constant dense<0.000000e+00> : vector<128xf32>
    %112 = vector.multi_reduction <add>, %108, %cst_34 [0] : vector<9x128xf32> to vector<128xf32>
    %113 = vector.shape_cast %112 : vector<128xf32> to vector<1x128xf32>
    %114 = tpu.reciprocal %113 {approx = true} : vector<1x128xf32> -> vector<1x128xf32>
    %115 = vector.extract_strided_slice %34 {offsets = [0, 0], sizes = [4, 1152], strides = [1, 1]} : vector<10x1152xf32> to vector<4x1152xf32>
    %116 = vector.extract_strided_slice %34 {offsets = [4, 0], sizes = [4, 1152], strides = [1, 1]} : vector<10x1152xf32> to vector<4x1152xf32>
    %117 = vector.extract_strided_slice %103 {offsets = [0, 0], sizes = [1, 128], strides = [1, 1]} : vector<9x128xf32> to vector<1x128xf32>
    %118 = vector.extract_strided_slice %115 {offsets = [0, 0], sizes = [4, 128], strides = [1, 1]} : vector<4x1152xf32> to vector<4x128xf32>
    %119 = vector.broadcast %117 : vector<1x128xf32> to vector<4x128xf32>
    %120 = arith.mulf %119, %118 : vector<4x128xf32>
    %121 = vector.extract_strided_slice %108 {offsets = [0, 0], sizes = [1, 128], strides = [1, 1]} : vector<9x128xf32> to vector<1x128xf32>
    %122 = vector.extract_strided_slice %116 {offsets = [0, 0], sizes = [4, 128], strides = [1, 1]} : vector<4x1152xf32> to vector<4x128xf32>
    %123 = vector.broadcast %121 : vector<1x128xf32> to vector<4x128xf32>
    %124 = arith.mulf %123, %122 : vector<4x128xf32>
    %125 = vector.extract_strided_slice %103 {offsets = [1, 0], sizes = [1, 128], strides = [1, 1]} : vector<9x128xf32> to vector<1x128xf32>
    %126 = vector.extract_strided_slice %115 {offsets = [0, 128], sizes = [4, 128], strides = [1, 1]} : vector<4x1152xf32> to vector<4x128xf32>
    %127 = vector.broadcast %125 : vector<1x128xf32> to vector<4x128xf32>
    %128 = arith.mulf %127, %126 : vector<4x128xf32>
    %129 = arith.addf %120, %128 : vector<4x128xf32>
    %130 = vector.extract_strided_slice %108 {offsets = [1, 0], sizes = [1, 128], strides = [1, 1]} : vector<9x128xf32> to vector<1x128xf32>
    %131 = vector.extract_strided_slice %116 {offsets = [0, 128], sizes = [4, 128], strides = [1, 1]} : vector<4x1152xf32> to vector<4x128xf32>
    %132 = vector.broadcast %130 : vector<1x128xf32> to vector<4x128xf32>
    %133 = arith.mulf %132, %131 : vector<4x128xf32>
    %134 = arith.addf %124, %133 : vector<4x128xf32>
    %135 = vector.extract_strided_slice %103 {offsets = [2, 0], sizes = [1, 128], strides = [1, 1]} : vector<9x128xf32> to vector<1x128xf32>
    %136 = vector.extract_strided_slice %115 {offsets = [0, 256], sizes = [4, 128], strides = [1, 1]} : vector<4x1152xf32> to vector<4x128xf32>
    %137 = vector.broadcast %135 : vector<1x128xf32> to vector<4x128xf32>
    %138 = arith.mulf %137, %136 : vector<4x128xf32>
    %139 = arith.addf %129, %138 : vector<4x128xf32>
    %140 = vector.extract_strided_slice %108 {offsets = [2, 0], sizes = [1, 128], strides = [1, 1]} : vector<9x128xf32> to vector<1x128xf32>
    %141 = vector.extract_strided_slice %116 {offsets = [0, 256], sizes = [4, 128], strides = [1, 1]} : vector<4x1152xf32> to vector<4x128xf32>
    %142 = vector.broadcast %140 : vector<1x128xf32> to vector<4x128xf32>
    %143 = arith.mulf %142, %141 : vector<4x128xf32>
    %144 = arith.addf %134, %143 : vector<4x128xf32>
    %145 = vector.extract_strided_slice %103 {offsets = [3, 0], sizes = [1, 128], strides = [1, 1]} : vector<9x128xf32> to vector<1x128xf32>
    %146 = vector.extract_strided_slice %115 {offsets = [0, 384], sizes = [4, 128], strides = [1, 1]} : vector<4x1152xf32> to vector<4x128xf32>
    %147 = vector.broadcast %145 : vector<1x128xf32> to vector<4x128xf32>
    %148 = arith.mulf %147, %146 : vector<4x128xf32>
    %149 = arith.addf %139, %148 : vector<4x128xf32>
    %150 = vector.extract_strided_slice %108 {offsets = [3, 0], sizes = [1, 128], strides = [1, 1]} : vector<9x128xf32> to vector<1x128xf32>
    %151 = vector.extract_strided_slice %116 {offsets = [0, 384], sizes = [4, 128], strides = [1, 1]} : vector<4x1152xf32> to vector<4x128xf32>
    %152 = vector.broadcast %150 : vector<1x128xf32> to vector<4x128xf32>
    %153 = arith.mulf %152, %151 : vector<4x128xf32>
    %154 = arith.addf %144, %153 : vector<4x128xf32>
    %155 = vector.extract_strided_slice %103 {offsets = [4, 0], sizes = [1, 128], strides = [1, 1]} : vector<9x128xf32> to vector<1x128xf32>
    %156 = vector.extract_strided_slice %115 {offsets = [0, 512], sizes = [4, 128], strides = [1, 1]} : vector<4x1152xf32> to vector<4x128xf32>
    %157 = vector.broadcast %155 : vector<1x128xf32> to vector<4x128xf32>
    %158 = arith.mulf %157, %156 : vector<4x128xf32>
    %159 = arith.addf %149, %158 : vector<4x128xf32>
    %160 = vector.extract_strided_slice %108 {offsets = [4, 0], sizes = [1, 128], strides = [1, 1]} : vector<9x128xf32> to vector<1x128xf32>
    %161 = vector.extract_strided_slice %116 {offsets = [0, 512], sizes = [4, 128], strides = [1, 1]} : vector<4x1152xf32> to vector<4x128xf32>
    %162 = vector.broadcast %160 : vector<1x128xf32> to vector<4x128xf32>
    %163 = arith.mulf %162, %161 : vector<4x128xf32>
    %164 = arith.addf %154, %163 : vector<4x128xf32>
    %165 = vector.extract_strided_slice %103 {offsets = [5, 0], sizes = [1, 128], strides = [1, 1]} : vector<9x128xf32> to vector<1x128xf32>
    %166 = vector.extract_strided_slice %115 {offsets = [0, 640], sizes = [4, 128], strides = [1, 1]} : vector<4x1152xf32> to vector<4x128xf32>
    %167 = vector.broadcast %165 : vector<1x128xf32> to vector<4x128xf32>
    %168 = arith.mulf %167, %166 : vector<4x128xf32>
    %169 = arith.addf %159, %168 : vector<4x128xf32>
    %170 = vector.extract_strided_slice %108 {offsets = [5, 0], sizes = [1, 128], strides = [1, 1]} : vector<9x128xf32> to vector<1x128xf32>
    %171 = vector.extract_strided_slice %116 {offsets = [0, 640], sizes = [4, 128], strides = [1, 1]} : vector<4x1152xf32> to vector<4x128xf32>
    %172 = vector.broadcast %170 : vector<1x128xf32> to vector<4x128xf32>
    %173 = arith.mulf %172, %171 : vector<4x128xf32>
    %174 = arith.addf %164, %173 : vector<4x128xf32>
    %175 = vector.extract_strided_slice %103 {offsets = [6, 0], sizes = [1, 128], strides = [1, 1]} : vector<9x128xf32> to vector<1x128xf32>
    %176 = vector.extract_strided_slice %115 {offsets = [0, 768], sizes = [4, 128], strides = [1, 1]} : vector<4x1152xf32> to vector<4x128xf32>
    %177 = vector.broadcast %175 : vector<1x128xf32> to vector<4x128xf32>
    %178 = arith.mulf %177, %176 : vector<4x128xf32>
    %179 = arith.addf %169, %178 : vector<4x128xf32>
    %180 = vector.extract_strided_slice %108 {offsets = [6, 0], sizes = [1, 128], strides = [1, 1]} : vector<9x128xf32> to vector<1x128xf32>
    %181 = vector.extract_strided_slice %116 {offsets = [0, 768], sizes = [4, 128], strides = [1, 1]} : vector<4x1152xf32> to vector<4x128xf32>
    %182 = vector.broadcast %180 : vector<1x128xf32> to vector<4x128xf32>
    %183 = arith.mulf %182, %181 : vector<4x128xf32>
    %184 = arith.addf %174, %183 : vector<4x128xf32>
    %185 = vector.extract_strided_slice %103 {offsets = [7, 0], sizes = [1, 128], strides = [1, 1]} : vector<9x128xf32> to vector<1x128xf32>
    %186 = vector.extract_strided_slice %115 {offsets = [0, 896], sizes = [4, 128], strides = [1, 1]} : vector<4x1152xf32> to vector<4x128xf32>
    %187 = vector.broadcast %185 : vector<1x128xf32> to vector<4x128xf32>
    %188 = arith.mulf %187, %186 : vector<4x128xf32>
    %189 = arith.addf %179, %188 : vector<4x128xf32>
    %190 = vector.extract_strided_slice %108 {offsets = [7, 0], sizes = [1, 128], strides = [1, 1]} : vector<9x128xf32> to vector<1x128xf32>
    %191 = vector.extract_strided_slice %116 {offsets = [0, 896], sizes = [4, 128], strides = [1, 1]} : vector<4x1152xf32> to vector<4x128xf32>
    %192 = vector.broadcast %190 : vector<1x128xf32> to vector<4x128xf32>
    %193 = arith.mulf %192, %191 : vector<4x128xf32>
    %194 = arith.addf %184, %193 : vector<4x128xf32>
    %195 = vector.extract_strided_slice %103 {offsets = [8, 0], sizes = [1, 128], strides = [1, 1]} : vector<9x128xf32> to vector<1x128xf32>
    %196 = vector.extract_strided_slice %115 {offsets = [0, 1024], sizes = [4, 128], strides = [1, 1]} : vector<4x1152xf32> to vector<4x128xf32>
    %197 = vector.broadcast %195 : vector<1x128xf32> to vector<4x128xf32>
    %198 = arith.mulf %197, %196 : vector<4x128xf32>
    %199 = arith.addf %189, %198 : vector<4x128xf32>
    %200 = vector.extract_strided_slice %108 {offsets = [8, 0], sizes = [1, 128], strides = [1, 1]} : vector<9x128xf32> to vector<1x128xf32>
    %201 = vector.extract_strided_slice %116 {offsets = [0, 1024], sizes = [4, 128], strides = [1, 1]} : vector<4x1152xf32> to vector<4x128xf32>
    %202 = vector.broadcast %200 : vector<1x128xf32> to vector<4x128xf32>
    %203 = arith.mulf %202, %201 : vector<4x128xf32>
    %204 = arith.addf %194, %203 : vector<4x128xf32>
    %205 = vector.broadcast %111 : vector<1x128xf32> to vector<4x128xf32>
    %206 = arith.mulf %199, %205 : vector<4x128xf32>
    %207 = vector.broadcast %114 : vector<1x128xf32> to vector<4x128xf32>
    %208 = arith.mulf %204, %207 : vector<4x128xf32>
    %209 = tpu.concatenate %206, %208 in 0 : vector<4x128xf32>, vector<4x128xf32> -> vector<8x128xf32>
    %210 = vector.broadcast %3 : vector<8x1xf32> to vector<8x128xf32>
    %211 = arith.mulf %209, %210 : vector<8x128xf32>
    %212 = vector.broadcast %4 : vector<8x1xf32> to vector<8x128xf32>
    %213 = arith.addf %211, %212 : vector<8x128xf32>
    %cst_35 = arith.constant 0.000000e+00 : f32
    %214 = vector.broadcast %cst_35 : f32 to vector<8x128xf32>
    %215 = arith.maximumf %213, %214 : vector<8x128xf32>
    %c0_36 = arith.constant 0 : index
    %c0_37 = arith.constant 0 : index
    %216 = vector.load %arg3[%c0_36, %c0_37] : memref<8x8xf32, #tpu.memory_space<vmem>>, vector<8x8xf32>
    %cst_38 = arith.constant dense<0.000000e+00> : vector<8x128xf32>
    %217 = tpu.matmul %216, %215, %cst_38 {dimension_numbers = #tpu.dot_dimension_numbers<[1], [0], [0], [1], [0, 0, 1, 1], [], []>} : vector<8x8xf32>, vector<8x128xf32>, vector<8x128xf32> -> vector<8x128xf32>
    %218 = vector.broadcast %5 : vector<8x1xf32> to vector<8x128xf32>
    %219 = arith.addf %217, %218 : vector<8x128xf32>
    %220 = arith.addf %219, %0 : vector<8x128xf32>
    %c0_39 = arith.constant 0 : index
    %c0_40 = arith.constant 0 : index
    %221 = vector.load %arg7[%c0_39, %c0_40] : memref<8x128xf32, #tpu.memory_space<vmem>>, vector<8x128xf32>
    tpu.vector_store %arg7[%c0_39, %c0_40], %220 {strides = array<i32>} : memref<8x128xf32, #tpu.memory_space<vmem>>, vector<8x128xf32>,
    return
  }
}

</mosaic_0001>

<bundles_post_ra>
// kernel: tpu_custom_call.1
= control target key start
LH: loop header
LB: loop body
LE: loop exit
PB: predicated region body
PF: predicated region fallthrough
CT: control target
= control target key end

     0   :  { %12 = vsyncpa [#allocation3], 0  ;;  %s2095_s0 = inlined_call_operand.vmem [shape: f32[8,128], index: 0, kind: input, shape index: {}]   ;;  %s2096_s1 = inlined_call_operand.hbm [shape: bf16[128,1152], index: 1, kind: input, shape index: {}]   ;;  %s2097_s2 = inlined_call_operand.vmem [shape: f32[12,8], index: 2, kind: input, shape index: {}]   ;;  %s2098_s3 = inlined_call_operand.vmem [shape: f32[8,8], index: 3, kind: input, shape index: {}]   ;;  %s2099_s4 = inlined_call_operand.vmem [shape: f32[8,5], index: 4, kind: input, shape index: {}]   ;;  %s2100_s5 = inlined_call_operand.vmem [shape: f32[2,9,128], index: 5, kind: input, shape index: {}]   ;;  %s2101_s6 = inlined_call_operand.vmem [shape: f32[10], index: 6, kind: input, shape index: {}]   ;;  %s2102_s7 = inlined_call_operand.hbm [shape: f32[8,128], index: 7, kind: output, shape index: {}]  }
   0x1   :  { %13 = vsyncpa [#allocation5], 0 }
   0x2   :  { %14 = vsyncpa [#allocation4], 0  ;;  %s21_s26 = sshll.u32 %s2096_s1, 4  ;;  %s1576_s27 = smov [#allocation2]   ;;  %s22_s26 = int_to_ptr.hbm [resolvable:$true] %s21_s26 }
   0x3   :  { %s23_s28 = sshll.u32 %s1576_s27, 4  ;;  %s43_s8 = sshll.u32 %s2101_s6, 4  ;;  %s24_s28 = int_to_ptr.vmem [resolvable:$true] %s23_s28  ;;  %s44_s8 = int_to_ptr.vmem [resolvable:$true] %s43_s8 }
   0x4   :  { %s1577_s9 = smov 576   ;;  %s1578_s10 = smov 36  }
   0x5   :  { %29 = dma.hbm_to_vmem [thread:$0]  %s22_s26, 9216, %s24_s28, [#allocation3], %s1577_s9, %s1577_s9, %s1578_s10  }
   0x6   :  { %s1579_s11 = smov [#allocation6]  }
   0x7   :  { %46 = dma.vmem_to_smem %s44_s8, 16, %s1579_s11, [#allocation5]  }
   0x8   :  { %1570 = dma.done.wait [#allocation3], 9216  }
   0x9   :  { %1571 = vsyncadd [#allocation3], 4294958080 }
   0xa   :  { %1572 = dma.done.wait [#allocation5], 16  }
   0xb   :  { %1573 = vsyncadd [#allocation5], 4294967280 }
   0xc   :  { %55 = sfence }
   0xd   :  { %v1635_v0 = vld [vmem:[%s2099_s4] sm:$0xff]  ;;  %v1580_v1 = vmov 0   ;;  %v1581_v2 = vmov 1   ;;  %v1371_v3 = vld [vmem:[#allocation2 + $0x1f8] sm:$0xf]  ;;  %vm82_vm0 = vcmask 64512  }
   0xe   :  { %2119 = vst [vmem:[#allocation11_spill] sm:$0xff] %v1635_v0  ;;  %1490 = vset.pattern.permute.xlu0 %v1580_v1  ;;  %v1475_v4 = vld [vmem:[#allocation2 + $0x218] sm:$0xf0]  ;;  %v1373_v7 = vld [vmem:[#allocation2 + $0x21c] sm:$0xf0]  ;;  %vm846_vm1 = vcmask 1040384  }
   0xf   :  { %70 = vperm.xlu0 %1490, %v1635_v0   ;;  %v1471_v5 = vld [vmem:[#allocation2 + $0x1fc] sm:$0xf]  ;;  %v1639_v6 = vor.u32 %v1475_v4, %v1371_v3  ;;  %v1379_v8 = vld [vmem:[#allocation2 + $0x200] sm:$0xf]  ;;  %v1476_v9 = vld [vmem:[#allocation2 + $0x220] sm:$0xf0] }
  0x10   :  { %v1641_v10 = vor.u32 %v1471_v5, %v1373_v7  ;;  %v1643_v11 = vor.u32 %v1476_v9, %v1379_v8  ;;  %v1335_v12 = vld [vmem:[#allocation2 + $0x1b0] sm:$0xf]  ;;  %v1466_v13 = vld [vmem:[#allocation2 + $0x1d0] sm:$0xf0]  ;;  %v1337_v15 = vld [vmem:[#allocation2 + $0x1d4] sm:$0xf0] }
  0x11   :  { %567 = vmatpush.bf16.msra.mxu1 %v1639_v6  ;;  %v1462_v14 = vld [vmem:[#allocation2 + $0x1b4] sm:$0xf]  ;;  %v1648_v16 = vor.u32 %v1466_v13, %v1335_v12  ;;  %v1343_v18 = vld [vmem:[#allocation2 + $0x1b8] sm:$0xf]  ;;  %v1467_v19 = vld [vmem:[#allocation2 + $0x1d8] sm:$0xf0] }
  0x12   :  { %581 = vmatpush.bf16.msra.mxu2 %v1641_v10  ;;  %595 = vmatpush.bf16.msra.mxu3 %v1643_v11  ;;  %v1650_v17 = vor.u32 %v1462_v14, %v1337_v15  ;;  %v1652_v20 = vor.u32 %v1467_v19, %v1343_v18  ;;  %v1299_v21 = vld [vmem:[#allocation2 + $0x168] sm:$0xf]  ;;  %v1457_v22 = vld [vmem:[#allocation2 + $0x188] sm:$0xf0]  ;;  %v1301_v24 = vld [vmem:[#allocation2 + $0x18c] sm:$0xf0] }
  0x13   :  { %v1453_v23 = vld [vmem:[#allocation2 + $0x16c] sm:$0xf]  ;;  %v1307_v25 = vld [vmem:[#allocation2 + $0x170] sm:$0xf]  ;;  %v1655_v26 = vor.u32 %v1457_v22, %v1299_v21  ;;  %v1458_v27 = vld [vmem:[#allocation2 + $0x190] sm:$0xf0] }
  0x14   :  { %v1659_v28 = vor.u32 %v1453_v23, %v1301_v24  ;;  %v1661_v29 = vor.u32 %v1458_v27, %v1307_v25  ;;  %v1263_v30 = vld [vmem:[#allocation2 + $0x120] sm:$0xf]  ;;  %v1448_v31 = vld [vmem:[#allocation2 + $0x140] sm:$0xf0]  ;;  %v1265_v34 = vld [vmem:[#allocation2 + $0x144] sm:$0xf0] }
  0x15   :  { %568 = vmatpush.bf16.msra.mxu1 %v1648_v16  ;;  %v1444_v32 = vld [vmem:[#allocation2 + $0x124] sm:$0xf]  ;;  %v1271_v35 = vld [vmem:[#allocation2 + $0x128] sm:$0xf]  ;;  %v1449_v36 = vld [vmem:[#allocation2 + $0x148] sm:$0xf0]  ;;  %v1664_v37 = vor.u32 %v1448_v31, %v1263_v30 }
  0x16   :  { %582 = vmatpush.bf16.msra.mxu2 %v1650_v17  ;;  %596 = vmatpush.bf16.msra.mxu3 %v1652_v20  ;;  %v1668_v38 = vor.u32 %v1444_v32, %v1265_v34  ;;  %v1670_v39 = vor.u32 %v1449_v36, %v1271_v35  ;;  %v1227_v40 = vld [vmem:[#allocation2 + $0xd8] sm:$0xf]  ;;  %v1439_v41 = vld [vmem:[#allocation2 + $0xf8] sm:$0xf0]  ;;  %v1229_v43 = vld [vmem:[#allocation2 + $0xfc] sm:$0xf0] }
  0x17   :  { %1491 = vset.pattern.permute.xlu0 %v1581_v2  ;;  %v1435_v42 = vld [vmem:[#allocation2 + $0xdc] sm:$0xf]  ;;  %v1235_v44 = vld [vmem:[#allocation2 + $0xe0] sm:$0xf]  ;;  %v1440_v45 = vld [vmem:[#allocation2 + $0x100] sm:$0xf0]  ;;  %v1676_v47 = vor.u32 %v1439_v41, %v1227_v40 }
  0x18   :  { %75 = vperm.xlu0 %1491, %v1635_v0   ;;  %v56_v46 = vld [vmem:[%s2095_s0] sm:$0xff]  ;;  %v1680_v48 = vor.u32 %v1435_v42, %v1229_v43  ;;  %v1682_v49 = vor.u32 %v1440_v45, %v1235_v44  ;;  %v1191_v50 = vld [vmem:[#allocation2 + $0x90] sm:$0xf]  ;;  %v1430_v51 = vld [vmem:[#allocation2 + $0xb0] sm:$0xf0]  ;;  %vm848_vm2 = vcmask 1041408  }
  0x19   :  { %569 = vmatpush.bf16.msra.mxu1 %v1655_v26  ;;  %v1472_v53 = vld [vmem:[#allocation2 + $0x204] sm:$0xf]  ;;  %v1426_v54 = vld [vmem:[#allocation2 + $0x94] sm:$0xf]  ;;  %v1193_v55 = vld [vmem:[#allocation2 + $0xb4] sm:$0xf0]  ;;  %v1688_v62 = vor.u32 %v1430_v51, %v1191_v50 }
  0x1a   :  { %583 = vmatpush.bf16.msra.mxu2 %v1659_v28  ;;  %597 = vmatpush.bf16.msra.mxu3 %v1661_v29  ;;  %v1381_v57 = vld [vmem:[#allocation2 + $0x224] sm:$0xf0]  ;;  %v1199_v58 = vld [vmem:[#allocation2 + $0x98] sm:$0xf]  ;;  %v1431_v59 = vld [vmem:[#allocation2 + $0xb8] sm:$0xf0]  ;;  %v1692_v1 = vor.u32 %v1426_v54, %v1193_v55 }
  0x1b   :  { %v80_v61 = vld [vmem:[%s2097_s2] sm:$0xff]  ;;  %v1463_v63 = vld [vmem:[#allocation2 + $0x1bc] sm:$0xf]  ;;  %v1155_v2 = vld [vmem:[#allocation2 + $0x48] sm:$0xf]  ;;  %v1694_v5 = vor.u32 %v1472_v53, %v1381_v57  ;;  %v1696_v7 = vor.u32 %v1431_v59, %v1199_v58  ;;  %vm850_vm3 = vcmask 1042432  }
  0x1c   :  { %v1421_v3 = vld [vmem:[#allocation2 + $0x68] sm:$0xf0]  ;;  %v1157_v9 = vld [vmem:[#allocation2 + $0x6c] sm:$0xf0]  ;;  %v1345_v12 = vld [vmem:[#allocation2 + $0x1dc] sm:$0xf0] }
  0x1d   :  { %570 = vmatpush.bf16.msra.mxu1 %v1664_v37  ;;  %v1417_v8 = vld [vmem:[#allocation2 + $0x4c] sm:$0xf]  ;;  %v1163_v13 = vld [vmem:[#allocation2 + $0x50] sm:$0xf]  ;;  %v1422_v14 = vld [vmem:[#allocation2 + $0x70] sm:$0xf0]  ;;  %v1699_v15 = vor.u32 %v1421_v3, %v1155_v2  ;;  %v1706_v23 = vor.u32 %v1463_v63, %v1345_v12 }
  0x1e   :  { %584 = vmatpush.bf16.msra.mxu2 %v1668_v38  ;;  %598 = vmatpush.bf16.msra.mxu3 %v1670_v39  ;;  %v1454_v18 = vld [vmem:[#allocation2 + $0x174] sm:$0xf]  ;;  %v1703_v19 = vor.u32 %v1417_v8, %v1157_v9  ;;  %v1119_v21 = vld [vmem:[#allocation2] sm:$0xf]  ;;  %v1412_v22 = vld [vmem:[#allocation2 + $0x20] sm:$0xf0]  ;;  %v1709_v25 = vor.u32 %v1422_v14, %v1163_v13 }
  0x1f   :  { %v1309_v24 = vld [vmem:[#allocation2 + $0x194] sm:$0xf0]  ;;  %v1408_v27 = vld [vmem:[#allocation2 + $0x4] sm:$0xf]  ;;  %v1121_v30 = vld [vmem:[#allocation2 + $0x24] sm:$0xf0]  ;;  %v1712_v34 = vor.u32 %v1412_v22, %v1119_v21 }
  0x20   :  { %v1127_v31 = vld [vmem:[#allocation2 + $0x8] sm:$0xf]  ;;  %v1413_v32 = vld [vmem:[#allocation2 + $0x28] sm:$0xf0]  ;;  %v1389_v40 = vld [vmem:[#allocation2 + $0x22c] sm:$0xf0]  ;;  %v1715_v41 = vor.u32 %v1408_v27, %v1121_v30  ;;  %v1721_v45 = vor.u32 %v1454_v18, %v1309_v24 }
  0x21   :  { %571 = vmatpush.bf16.msra.mxu1 %v1676_v47  ;;  %v1477_v35 = vld [vmem:[#allocation2 + $0x228] sm:$0xf0]  ;;  %v1395_v42 = vld [vmem:[#allocation2 + $0x210] sm:$0xf]  ;;  %v1478_v43 = vld [vmem:[#allocation2 + $0x230] sm:$0xf0] }
  0x22   :  { %585 = vmatpush.bf16.msra.mxu2 %v1680_v48  ;;  %599 = vmatpush.bf16.msra.mxu3 %v1682_v49  ;;  %v1473_v36 = vld [vmem:[#allocation2 + $0x20c] sm:$0xf]  ;;  %v81_v44 = vld [vmem:[%s2097_s2 + $0x8] sm:$0xf]  ;;  %v1273_v51 = vld [vmem:[#allocation2 + $0x14c] sm:$0xf0]  ;;  %v1731_v55 = vor.u32 %v1478_v43, %v1395_v42 }
  0x23   :  { %v1445_v50 = vld [vmem:[#allocation2 + $0x12c] sm:$0xf]  ;;  %v1728_v53 = vor.u32 %v1473_v36, %v1389_v40  ;;  %v1351_v54 = vld [vmem:[#allocation2 + $0x1c0] sm:$0xf]  ;;  %v1464_v57 = vld [vmem:[#allocation2 + $0x1c4] sm:$0xf] }
  0x24   :  { %v1353_v58 = vld [vmem:[#allocation2 + $0x1e4] sm:$0xf0]  ;;  %v1436_v63 = vld [vmem:[#allocation2 + $0xe4] sm:$0xf]  ;;  %v1315_v8 = vld [vmem:[#allocation2 + $0x178] sm:$0xf] }
  0x25   :  { %572 = vmatpush.bf16.msra.mxu1 %v1688_v62  ;;  %v1359_v59 = vld [vmem:[#allocation2 + $0x1c8] sm:$0xf]  ;;  %v1459_v12 = vld [vmem:[#allocation2 + $0x198] sm:$0xf0]  ;;  %v1317_v14 = vld [vmem:[#allocation2 + $0x19c] sm:$0xf0] }
  0x26   :  { %586 = vmatpush.bf16.msra.mxu2 %v1692_v1  ;;  %600 = vmatpush.bf16.msra.mxu3 %v1696_v7  ;;  %v1237_v2 = vld [vmem:[#allocation2 + $0x104] sm:$0xf0]  ;;  %v1455_v13 = vld [vmem:[#allocation2 + $0x17c] sm:$0xf]  ;;  %v1323_v18 = vld [vmem:[#allocation2 + $0x180] sm:$0xf]  ;;  %v1753_v30 = vor.u32 %v1459_v12, %v1315_v8 }
  0x27   :  { %v1460_v21 = vld [vmem:[#allocation2 + $0x1a0] sm:$0xf0]  ;;  %v1749_v22 = vor.u32 %v1436_v63, %v1237_v2  ;;  %v1427_v24 = vld [vmem:[#allocation2 + $0x9c] sm:$0xf]  ;;  %v1201_v27 = vld [vmem:[#allocation2 + $0xbc] sm:$0xf0] }
  0x28   :  { %v1165_v36 = vld [vmem:[#allocation2 + $0x74] sm:$0xf0]  ;;  %v1409_v42 = vld [vmem:[#allocation2 + $0xc] sm:$0xf]  ;;  %v1129_v43 = vld [vmem:[#allocation2 + $0x2c] sm:$0xf0] }
  0x29   :  { %573 = vmatpush.bf16.msra.mxu1 %v1699_v15  ;;  %v1279_v2 = vld [vmem:[#allocation2 + $0x130] sm:$0xf]  ;;  %v1450_v8 = vld [vmem:[#allocation2 + $0x150] sm:$0xf0]  ;;  %vm852_vm4 = vcmask 1043456   ;;  %s1988_s2 = sld [smem:[#allocation6]] }
  0x2a   :  { %587 = vmatpush.bf16.msra.mxu2 %v1703_v19  ;;  %601 = vmatpush.bf16.msra.mxu3 %v1709_v25  ;;  %v1446_v12 = vld [vmem:[#allocation2 + $0x134] sm:$0xf]  ;;  %s1992_s18 = sld [smem:[#allocation6 + $0x1]]  ;;  %vm854_vm5 = vcmask 1044480   ;;  %vm856_vm6 = vcmask 1045504   ;;  %vm858_vm7 = vcmask 1046528  }
  0x2b   :  { %s1994_s19 = sld [smem:[#allocation6 + $0x2]]  ;;  %s1095_s16 = sshll.u32 %s2102_s7, 4  ;;  %s1096_s16 = int_to_ptr.hbm [resolvable:$true] %s1095_s16 }
  0x2c   :  { %s2000_s20 = sld [smem:[#allocation6 + $0x3]] }
  0x2d   :  { %574 = vmatpush.bf16.msra.mxu1 %v1712_v34  ;;  %s2002_s21 = sld [smem:[#allocation6 + $0x4]] }
  0x2e   :  { %588 = vmatpush.bf16.msra.mxu2 %v1715_v41  ;;  %s2005_s22 = sld [smem:[#allocation6 + $0x5]] }
  0x2f   :  { %s2016_s23 = sld [smem:[#allocation6 + $0x6]] }
  0x30   :  { %s2018_s24 = sld [smem:[#allocation6 + $0x7]] }
  0x31   :  { %s2020_s25 = sld [smem:[#allocation6 + $0x8]] }
  0x32   :  { %637 = vmatpush.bf16.msrb.mxu2 %v1728_v53  ;;  %s2022_s26 = sld [smem:[#allocation6 + $0x9]] }
  0x81   :  { %v71_v33 = vpop.permute.xlu0 %70 }
  0x82   :  { %v73_v52 = vmul.f32 %v71_v33, %v56_v46  ;;  %v1387_v33 = vld [vmem:[#allocation2 + $0x208] sm:$0xf]  ;;  %v1724_v46 = vor.u32 %v1413_v32, %v1127_v31  ;;  %v1755_v31 = vor.u32 %v1455_v13, %v1317_v14  ;;  %v1758_v32 = vor.u32 %v1460_v21, %v1323_v18  ;;  %v1281_v14 = vld [vmem:[#allocation2 + $0x154] sm:$0xf0]  ;;  %v1451_v21 = vld [vmem:[#allocation2 + $0x158] sm:$0xf0] }
  0x83   :  { %v1782_v13 = vor.u32 %v1450_v8, %v1279_v2  ;;  %v1287_v18 = vld [vmem:[#allocation2 + $0x138] sm:$0xf] }
  0x84   :  { %602 = vmatpush.bf16.msra.mxu3 %v1724_v46 }
  0x88   :  { %651 = vmatpush.bf16.msrb.mxu3 %v1731_v55 }
  0x8a   :  { %v76_v56 = vpop.permute.xlu0 %75 }
  0x8b   :  { %v78_v60 = vadd.f32 %v76_v56, %v73_v52  ;;  %v1726_v52 = vor.u32 %v1477_v35, %v1387_v33  ;;  %v1468_v56 = vld [vmem:[#allocation2 + $0x1e0] sm:$0xf0]  ;;  %v1761_v33 = vor.u32 %v1427_v24, %v1201_v27  ;;  %v1418_v35 = vld [vmem:[#allocation2 + $0x54] sm:$0xf]  ;;  %v1784_v24 = vor.u32 %v1446_v12, %v1281_v14  ;;  %v1253_v14 = vld [vmem:[#allocation2 + $0x114] sm:$0xf0] }
  0x8c   :  { %v1741_v3 = vor.u32 %v1468_v56, %v1351_v54  ;;  %v1767_v40 = vor.u32 %v1418_v35, %v1165_v36  ;;  %v1465_v56 = vld [vmem:[#allocation2 + $0x1cc] sm:$0xf]  ;;  %v1786_v27 = vor.u32 %v1451_v21, %v1287_v18  ;;  %v1447_v35 = vld [vmem:[#allocation2 + $0x13c] sm:$0xf]  ;;  %v1289_v36 = vld [vmem:[#allocation2 + $0x15c] sm:$0xf0] }
  0x8d   :  { %v79_v4 = vmax.f32 %v78_v60, 0.0  ;;  %v1469_v60 = vld [vmem:[#allocation2 + $0x1e8] sm:$0xf0]  ;;  %623 = vmatpush.bf16.msrb.mxu1 %v1726_v52  ;;  %v1438_v12 = vld [vmem:[#allocation2 + $0xf4] sm:$0xf] }
  0x8e   :  { %v1746_v9 = vor.u32 %v1469_v60, %v1359_v59  ;;  %v1456_v59 = vld [vmem:[#allocation2 + $0x184] sm:$0xf]  ;;  %v1325_v60 = vld [vmem:[#allocation2 + $0x1a4] sm:$0xf0]  ;;  %v1801_v18 = vor.u32 %v1438_v12, %v1253_v14  ;;  %v1207_v21 = vld [vmem:[#allocation2 + $0xa0] sm:$0xf] }
  0x8f   :  { %104 = vmatpush.msra.mxu0 %v79_v4  ;;  %v1743_v4 = vor.u32 %v1464_v57, %v1353_v58  ;;  %v1361_v57 = vld [vmem:[#allocation2 + $0x1ec] sm:$0xf0]  ;;  %v1779_v63 = vor.u32 %v1456_v59, %v1325_v60  ;;  %v1442_v60 = vld [vmem:[#allocation2 + $0x110] sm:$0xf0]  ;;  %v1429_v12 = vld [vmem:[#allocation2 + $0xac] sm:$0xf] }
  0x90   :  { %1115 = vmatmul.msk.f32.vlgmr.msra.gmra.mxu0 %vm82_vm0, %v80_v61  ;;  %v1736_v61 = vor.u32 %v1445_v50, %v1273_v51  ;;  %652 = vmatpush.bf16.msrb.mxu3 %v1746_v9  ;;  %v1397_v50 = vld [vmem:[#allocation2 + $0x234] sm:$0xf0]  ;;  %v1770_v51 = vor.u32 %v1409_v42, %v1129_v43  ;;  %v1776_v58 = vor.u32 %v1465_v56, %v1361_v57  ;;  %v1243_v43 = vld [vmem:[#allocation2 + $0xe8] sm:$0xf]  ;;  %v1245_v57 = vld [vmem:[#allocation2 + $0x10c] sm:$0xf0] }
  0x91   :  { %609 = vmatpush.bf16.msrb.mxu0 %v1694_v5  ;;  %624 = vmatpush.bf16.msrb.mxu1 %v1741_v3  ;;  %2123 = vst [vmem:[#allocation15_spill] sm:$0xff] %v1779_v63  ;;  %v1789_v42 = vor.u32 %v1447_v35, %v1289_v36  ;;  %v1251_v59 = vld [vmem:[#allocation2 + $0xf0] sm:$0xf]  ;;  %v1432_v35 = vld [vmem:[#allocation2 + $0xc0] sm:$0xf0] }
  0x92   :  { %638 = vmatpush.bf16.msrb.mxu2 %v1743_v4  ;;  %2120 = vst [vmem:[#allocation12_spill] sm:$0xff] %v1770_v51  ;;  %v1798_v8 = vor.u32 %v1442_v60, %v1251_v59  ;;  %v1428_v36 = vld [vmem:[#allocation2 + $0xa4] sm:$0xf]  ;;  %v1217_v14 = vld [vmem:[#allocation2 + $0xcc] sm:$0xf0] }
  0x93   :  { %2122 = vst [vmem:[#allocation14_spill] sm:$0xff] %v1776_v58  ;;  %v1813_v0 = vor.u32 %v1429_v12, %v1217_v14  ;;  %v1420_v12 = vld [vmem:[#allocation2 + $0x64] sm:$0xf]  ;;  %v1181_v14 = vld [vmem:[#allocation2 + $0x84] sm:$0xf0] }
  0x94   :  { %653 = vmatpush.bf16.msrb.mxu3 %v1758_v32  ;;  %2124 = vst [vmem:[#allocation16_spill] sm:$0xff] %v1789_v42 }
  0x95   :  { %610 = vmatpush.bf16.msrb.mxu0 %v1706_v23  ;;  %625 = vmatpush.bf16.msrb.mxu1 %v1753_v30  ;;  %2125 = vst [vmem:[#allocation17_spill] sm:$0xff] %v1801_v18 }
  0x96   :  { %639 = vmatpush.bf16.msrb.mxu2 %v1755_v31  ;;  %2126 = vst [vmem:[#allocation18_spill] sm:$0xff] %v1813_v0 }
  0x98   :  { %1116 = vmatmul.msk.f32.gmra.mxu0 %vm82_vm0, %v81_v44  ;;  %v1474_v44 = vld [vmem:[#allocation2 + $0x214] sm:$0xf]  ;;  %654 = vmatpush.bf16.msrb.mxu3 %v1786_v27 }
  0x99   :  { %611 = vmatpush.bf16.msrb.mxu0 %v1721_v45  ;;  %v1772_v54 = vor.u32 %v1474_v44, %v1397_v50  ;;  %626 = vmatpush.bf16.msrb.mxu1 %v1782_v13  ;;  %v1441_v44 = vld [vmem:[#allocation2 + $0x108] sm:$0xf0] }
  0x9a   :  { %640 = vmatpush.bf16.msrb.mxu2 %v1784_v24  ;;  %v1437_v50 = vld [vmem:[#allocation2 + $0xec] sm:$0xf]  ;;  %v1794_v56 = vor.u32 %v1441_v44, %v1243_v43  ;;  %v1806_v43 = vor.u32 %v1432_v35, %v1207_v21  ;;  %v1209_v44 = vld [vmem:[#allocation2 + $0xc4] sm:$0xf0]  ;;  %v1423_v21 = vld [vmem:[#allocation2 + $0x78] sm:$0xf0] }
  0x9b   :  { %2121 = vst [vmem:[#allocation13_spill] sm:$0xff] %v1772_v54  ;;  %v1796_v2 = vor.u32 %v1437_v50, %v1245_v57  ;;  %v1215_v50 = vld [vmem:[#allocation2 + $0xa8] sm:$0xf]  ;;  %v1433_v57 = vld [vmem:[#allocation2 + $0xc8] sm:$0xf0]  ;;  %v1808_v59 = vor.u32 %v1428_v36, %v1209_v44 }
  0x9c   :  { %655 = vmatpush.bf16.msrb.mxu3 %v1798_v8  ;;  %v1810_v60 = vor.u32 %v1433_v57, %v1215_v50  ;;  %v1419_v35 = vld [vmem:[#allocation2 + $0x5c] sm:$0xf]  ;;  %v1173_v36 = vld [vmem:[#allocation2 + $0x7c] sm:$0xf0]  ;;  %v1424_v50 = vld [vmem:[#allocation2 + $0x80] sm:$0xf0] }
  0x9d   :  { %612 = vmatpush.bf16.msrb.mxu0 %v1736_v61  ;;  %627 = vmatpush.bf16.msrb.mxu1 %v1794_v56  ;;  %v1179_v44 = vld [vmem:[#allocation2 + $0x60] sm:$0xf]  ;;  %v1820_v57 = vor.u32 %v1419_v35, %v1173_v36  ;;  %v1137_v35 = vld [vmem:[#allocation2 + $0x34] sm:$0xf0] }
  0x9e   :  { %641 = vmatpush.bf16.msrb.mxu2 %v1796_v2  ;;  %v1143_v36 = vld [vmem:[#allocation2 + $0x18] sm:$0xf] }
  0x9f   :  { %2127 = vst [vmem:[#allocation19_spill] sm:$0xff] %v1820_v57 }
  0xa0   :  { %656 = vmatpush.bf16.msrb.mxu3 %v1810_v60 }
  0xa1   :  { %613 = vmatpush.bf16.msrb.mxu0 %v1749_v22  ;;  %628 = vmatpush.bf16.msrb.mxu1 %v1806_v43 }
  0xa2   :  { %642 = vmatpush.bf16.msrb.mxu2 %v1808_v59 }
  0xa5   :  { %614 = vmatpush.bf16.msrb.mxu0 %v1761_v33 }
  0xa6   :  { %643 = vmatpush.bf16.msrb.mxu2 %v1820_v57 }
  0xa9   :  { %615 = vmatpush.bf16.msrb.mxu0 %v1767_v40 }
  0xad   :  { %616 = vmatpush.bf16.msrb.mxu0 %v1770_v51 }
  0xb1   :  { %665 = vmatpush.bf16.msra.mxu0 %v1772_v54 }
  0xb5   :  { %666 = vmatpush.bf16.msra.mxu0 %v1776_v58  ;;  %v1825_v58 = vor.u32 %v1420_v12, %v1181_v14  ;;  %v1411_v12 = vld [vmem:[#allocation2 + $0x1c] sm:$0xf]  ;;  %v1145_v14 = vld [vmem:[#allocation2 + $0x3c] sm:$0xf0] }
  0xb6   :  { %v1837_v57 = vor.u32 %v1411_v12, %v1145_v14  ;;  %v1479_v12 = vld [vmem:[#allocation2 + $0x238] sm:$0xf0] }
  0xb7   :  { %2129 = vst [vmem:[#allocation21_spill] sm:$0xff] %v1825_v58 }
  0xb8   :  { %2133 = vst [vmem:[#allocation25_spill] sm:$0xff] %v1837_v57 }
  0xb9   :  { %667 = vmatpush.bf16.msra.mxu0 %v1779_v63  ;;  %v1822_v63 = vor.u32 %v1424_v50, %v1179_v44  ;;  %v1415_v44 = vld [vmem:[#allocation2 + $0x38] sm:$0xf0] }
  0xba   :  { %v1834_v51 = vor.u32 %v1415_v44, %v1143_v36  ;;  %v1403_v44 = vld [vmem:[#allocation2 + $0x218] sm:$0xf] }
  0xbb   :  { %2128 = vst [vmem:[#allocation20_spill] sm:$0xff] %v1822_v63  ;;  %657 = vmatpush.bf16.msrb.mxu3 %v1822_v63  ;;  %v1470_v63 = vld [vmem:[#allocation2 + $0x1f0] sm:$0xf0] }
  0xbc   :  { %2132 = vst [vmem:[#allocation24_spill] sm:$0xff] %v1834_v51 }
  0xbd   :  { %668 = vmatpush.bf16.msra.mxu0 %v1789_v42 }
  0xbf   :  { %658 = vmatpush.bf16.msrb.mxu3 %v1834_v51 }
  0xc1   :  { %669 = vmatpush.bf16.msra.mxu0 %v1801_v18  ;;  %v1171_v18 = vld [vmem:[#allocation2 + $0x58] sm:$0xf] }
  0xc2   :  { %v1818_v42 = vor.u32 %v1423_v21, %v1171_v18  ;;  %v1414_v18 = vld [vmem:[#allocation2 + $0x30] sm:$0xf0] }
  0xc3   :  { %v1410_v21 = vld [vmem:[#allocation2 + $0x14] sm:$0xf] }
  0xc4   :  { %629 = vmatpush.bf16.msrb.mxu1 %v1818_v42  ;;  %v1832_v50 = vor.u32 %v1410_v21, %v1137_v35 }
  0xc5   :  { %670 = vmatpush.bf16.msra.mxu0 %v1813_v0  ;;  %v1135_v0 = vld [vmem:[#allocation2 + $0x10] sm:$0xf] }
  0xc6   :  { %v1830_v54 = vor.u32 %v1414_v18, %v1135_v0  ;;  %2131 = vst [vmem:[#allocation23_spill] sm:$0xff] %v1832_v50  ;;  %644 = vmatpush.bf16.msrb.mxu2 %v1832_v50 }
  0xc8   :  { %2130 = vst [vmem:[#allocation22_spill] sm:$0xff] %v1830_v54  ;;  %630 = vmatpush.bf16.msrb.mxu1 %v1830_v54  ;;  %v1367_v54 = vld [vmem:[#allocation2 + $0x1d0] sm:$0xf] }
  0xc9   :  { %671 = vmatpush.bf16.msra.mxu0 %v1825_v58 }
  0xcd   :  { %672 = vmatpush.bf16.msra.mxu0 %v1837_v57  ;;  %v1855_v57 = vor.u32 %v1479_v12, %v1403_v44  ;;  %v1295_v44 = vld [vmem:[#allocation2 + $0x140] sm:$0xf] }
 0x10d   :  { %v106_v0 = vpop.f32.mrf.mxu0 }
 0x10e   :  { %v1842_v18 = vpack.c.bf16 %v106_v0, %v106_v0 }
 0x110   :  { %v114_v21 = vunpack.c.l.bf16 %v1842_v18 }
 0x112   :  { %v116_v14 = vsub.f32 %v106_v0, %v114_v21  ;;  %v1863_v0 = vor.u32 %v1470_v63, %v1367_v54  ;;  %v1461_v21 = vld [vmem:[#allocation2 + $0x1a8] sm:$0xf0] }
 0x115   :  { %v1844_v58 = vpop.f32.mrf.mxu0 }
 0x116   :  { %v1849_v35 = vpack.c.bf16 %v1844_v58, %v1844_v58 }
 0x118   :  { %v115_v36 = vunpack.c.l.bf16 %v1849_v35 }
 0x11a   :  { %v117_v51 = vsub.f32 %v1844_v58, %v115_v36 }
 0x11c   :  { %v1853_v50 = vpack.c.bf16 %v117_v51, %v116_v14  ;;  %v1331_v51 = vld [vmem:[#allocation2 + $0x188] sm:$0xf] }
 0x11d   :  { %v1869_v36 = vor.u32 %v1461_v21, %v1331_v51 }
 0x11e   :  { %575 = vmatmul.bf16.vlgmr.msra.gmra.mxu1 %v1853_v50  ;;  %589 = vmatmul.bf16.vlgmr.msra.gmra.mxu2 %v1853_v50 }
 0x11f   :  { %603 = vmatmul.bf16.vlgmr.msra.gmra.mxu3 %v1853_v50  ;;  %617 = vmatmul.bf16.vlgmr.msrb.gmra.mxu0 %v1853_v50 }
 0x120   :  { %679 = vmatpush.bf16.msra.mxu1 %v1855_v57  ;;  %699 = vmatpush.bf16.msra.mxu2 %v1639_v6  ;;  %v1452_v6 = vld [vmem:[#allocation2 + $0x160] sm:$0xf0] }
 0x121   :  { %713 = vmatpush.bf16.msra.mxu3 %v1641_v10  ;;  %727 = vmatpush.bf16.msrb.mxu0 %v1643_v11  ;;  %v1875_v10 = vor.u32 %v1452_v6, %v1295_v44  ;;  %v1259_v11 = vld [vmem:[#allocation2 + $0xf8] sm:$0xf] }
 0x124   :  { %680 = vmatpush.bf16.msra.mxu1 %v1863_v0  ;;  %700 = vmatpush.bf16.msra.mxu2 %v1648_v16  ;;  %v1443_v16 = vld [vmem:[#allocation2 + $0x118] sm:$0xf0] }
 0x125   :  { %714 = vmatpush.bf16.msra.mxu3 %v1650_v17  ;;  %728 = vmatpush.bf16.msrb.mxu0 %v1652_v20  ;;  %v1881_v17 = vor.u32 %v1443_v16, %v1259_v11  ;;  %v1223_v20 = vld [vmem:[#allocation2 + $0xb0] sm:$0xf] }
 0x128   :  { %681 = vmatpush.bf16.msra.mxu1 %v1869_v36  ;;  %701 = vmatpush.bf16.msra.mxu2 %v1655_v26  ;;  %v1434_v26 = vld [vmem:[#allocation2 + $0xd0] sm:$0xf0] }
 0x129   :  { %715 = vmatpush.bf16.msra.mxu3 %v1659_v28  ;;  %729 = vmatpush.bf16.msrb.mxu0 %v1661_v29  ;;  %v1891_v28 = vor.u32 %v1434_v26, %v1223_v20  ;;  %v1187_v29 = vld [vmem:[#allocation2 + $0x68] sm:$0xf] }
 0x12c   :  { %682 = vmatpush.bf16.msra.mxu1 %v1875_v10  ;;  %702 = vmatpush.bf16.msra.mxu2 %v1664_v37  ;;  %v1425_v37 = vld [vmem:[#allocation2 + $0x88] sm:$0xf0] }
 0x12d   :  { %716 = vmatpush.bf16.msra.mxu3 %v1668_v38  ;;  %730 = vmatpush.bf16.msrb.mxu0 %v1670_v39  ;;  %v1897_v38 = vor.u32 %v1425_v37, %v1187_v29  ;;  %v1151_v39 = vld [vmem:[#allocation2 + $0x20] sm:$0xf] }
 0x12e   :  { %631 = vmatmul.bf16.vlgmr.msrb.gmra.mxu1 %v1853_v50  ;;  %645 = vmatmul.bf16.vlgmr.msrb.gmra.mxu2 %v1853_v50 }
 0x12f   :  { %659 = vmatmul.bf16.vlgmr.msrb.gmra.mxu3 %v1853_v50  ;;  %673 = vmatmul.bf16.vlgmr.msra.gmra.mxu0 %v1853_v50 }
 0x130   :  { %683 = vmatpush.bf16.msra.mxu1 %v1881_v17  ;;  %703 = vmatpush.bf16.msra.mxu2 %v1676_v47  ;;  %v1416_v47 = vld [vmem:[#allocation2 + $0x40] sm:$0xf0] }
 0x131   :  { %717 = vmatpush.bf16.msra.mxu3 %v1680_v48  ;;  %731 = vmatpush.bf16.msrb.mxu0 %v1682_v49  ;;  %v1903_v48 = vor.u32 %v1416_v47, %v1151_v39  ;;  %v696_v49 = vunpack.c.l.b16 %v1849_v35 }
 0x134   :  { %684 = vmatpush.bf16.msra.mxu1 %v1891_v28  ;;  %704 = vmatpush.bf16.msra.mxu2 %v1688_v62  ;;  %v695_v62 = vunpack.c.l.b16 %v1842_v18 }
 0x135   :  { %718 = vmatpush.bf16.msra.mxu3 %v1692_v1  ;;  %732 = vmatpush.bf16.msrb.mxu0 %v1696_v7  ;;  %v2135_v7 = vld [vmem:[#allocation20_spill] sm:$0xff] }
 0x136   :  { %v697_v1 = vpack.c.b16 %v696_v49, %v695_v62 }
 0x138   :  { %685 = vmatpush.bf16.msra.mxu1 %v1897_v38  ;;  %705 = vmatpush.bf16.msra.mxu2 %v1699_v15  ;;  %v2136_v15 = vld [vmem:[#allocation12_spill] sm:$0xff] }
 0x139   :  { %719 = vmatpush.bf16.msra.mxu3 %v1703_v19  ;;  %733 = vmatpush.bf16.msrb.mxu0 %v1709_v25  ;;  %v2137_v19 = vld [vmem:[#allocation22_spill] sm:$0xff]  ;;  %v2139_v25 = vld [vmem:[#allocation24_spill] sm:$0xff] }
 0x13c   :  { %686 = vmatpush.bf16.msra.mxu1 %v1903_v48  ;;  %706 = vmatpush.bf16.msra.mxu2 %v1712_v34  ;;  %v2140_v34 = vld [vmem:[#allocation13_spill] sm:$0xff] }
 0x13d   :  { %720 = vmatpush.bf16.msra.mxu3 %v1715_v41  ;;  %734 = vmatpush.bf16.msrb.mxu0 %v1724_v46  ;;  %v2141_v41 = vld [vmem:[#allocation14_spill] sm:$0xff]  ;;  %v2143_v46 = vld [vmem:[#allocation16_spill] sm:$0xff] }
 0x13f   :  { %687 = vmatmul.bf16.vlgmr.msra.gmra.mxu1 %v1853_v50  ;;  %707 = vmatmul.bf16.vlgmr.msra.gmra.mxu2 %v697_v1 }
 0x140   :  { %741 = vmatpush.bf16.msrb.mxu1 %v1694_v5  ;;  %755 = vmatpush.bf16.msrb.mxu2 %v1726_v52  ;;  %v2134_v5 = vld [vmem:[#allocation19_spill] sm:$0xff]  ;;  %v2144_v52 = vld [vmem:[#allocation17_spill] sm:$0xff] }
 0x141   :  { %769 = vmatpush.bf16.msrb.mxu3 %v1728_v53  ;;  %783 = vmatpush.bf16.msra.mxu0 %v1731_v55  ;;  %v2145_v53 = vld [vmem:[#allocation18_spill] sm:$0xff]  ;;  %v2146_v55 = vld [vmem:[#allocation21_spill] sm:$0xff] }
 0x142   :  { %721 = vmatmul.bf16.vlgmr.msra.gmra.mxu3 %v697_v1  ;;  %735 = vmatmul.bf16.vlgmr.msrb.gmra.mxu0 %v697_v1 }
 0x144   :  { %742 = vmatpush.bf16.msrb.mxu1 %v1706_v23  ;;  %756 = vmatpush.bf16.msrb.mxu2 %v1741_v3  ;;  %v2138_v23 = vld [vmem:[#allocation23_spill] sm:$0xff] }
 0x145   :  { %770 = vmatpush.bf16.msrb.mxu3 %v1743_v4  ;;  %784 = vmatpush.bf16.msra.mxu0 %v1746_v9 }
 0x148   :  { %743 = vmatpush.bf16.msrb.mxu1 %v1721_v45  ;;  %757 = vmatpush.bf16.msrb.mxu2 %v1753_v30  ;;  %v2142_v45 = vld [vmem:[#allocation15_spill] sm:$0xff] }
 0x149   :  { %771 = vmatpush.bf16.msrb.mxu3 %v1755_v31  ;;  %785 = vmatpush.bf16.msra.mxu0 %v1758_v32 }
 0x14c   :  { %744 = vmatpush.bf16.msrb.mxu1 %v1736_v61  ;;  %758 = vmatpush.bf16.msrb.mxu2 %v1782_v13  ;;  %v2147_v61 = vld [vmem:[#allocation25_spill] sm:$0xff]  ;;  %v1582_v13 = vmov 2  }
 0x14d   :  { %772 = vmatpush.bf16.msrb.mxu3 %v1784_v24  ;;  %786 = vmatpush.bf16.msra.mxu0 %v1786_v27  ;;  %v2148_v24 = vld [vmem:[#allocation11_spill] sm:$0xff] }
 0x14e   :  { %1492 = vset.pattern.permute.xlu1 %v1582_v13 }
 0x14f   :  { %1048 = vperm.xlu1 %1492, %v2148_v24  }
 0x150   :  { %745 = vmatpush.bf16.msrb.mxu1 %v1749_v22  ;;  %759 = vmatpush.bf16.msrb.mxu2 %v1794_v56 }
 0x151   :  { %773 = vmatpush.bf16.msrb.mxu3 %v1796_v2  ;;  %787 = vmatpush.bf16.msra.mxu0 %v1798_v8  ;;  %v1583_v8 = vmov 3  }
 0x154   :  { %746 = vmatpush.bf16.msrb.mxu1 %v1761_v33  ;;  %760 = vmatpush.bf16.msrb.mxu2 %v1806_v43 }
 0x155   :  { %774 = vmatpush.bf16.msrb.mxu3 %v1808_v59  ;;  %788 = vmatpush.bf16.msra.mxu0 %v1810_v60 }
 0x157   :  { %1493 = vset.pattern.permute.xlu1 %v1583_v8  ;;  %v893_v8 = vperm.slane %v1844_v58, 3 }
 0x158   :  { %747 = vmatpush.bf16.msrb.mxu1 %v1767_v40  ;;  %761 = vmatpush.bf16.msrb.mxu2 %v1818_v42 }
 0x159   :  { %775 = vmatpush.bf16.msrb.mxu3 %v2134_v5  ;;  %789 = vmatpush.bf16.msra.mxu0 %v2135_v7 }
 0x15a   :  { %1053 = vperm.xlu1 %1493, %v2148_v24  }
 0x15c   :  { %748 = vmatpush.bf16.msrb.mxu1 %v2136_v15  ;;  %762 = vmatpush.bf16.msrb.mxu2 %v2137_v19 }
 0x15d   :  { %776 = vmatpush.bf16.msrb.mxu3 %v2138_v23  ;;  %790 = vmatpush.bf16.msra.mxu0 %v2139_v25 }
 0x15f   :  { %749 = vmatmul.bf16.vlgmr.msrb.gmra.mxu1 %v697_v1  ;;  %763 = vmatmul.bf16.vlgmr.msrb.gmra.mxu2 %v697_v1 }
 0x160   :  { %797 = vmatpush.bf16.msra.mxu1 %v2140_v34  ;;  %811 = vmatpush.bf16.msra.mxu2 %v1855_v57 }
 0x161   :  { %777 = vmatmul.bf16.vlgmr.msrb.gmra.mxu3 %v697_v1  ;;  %791 = vmatmul.bf16.vlgmr.msra.gmra.mxu0 %v697_v1 }
 0x164   :  { %798 = vmatpush.bf16.msra.mxu1 %v2141_v41  ;;  %812 = vmatpush.bf16.msra.mxu2 %v1863_v0 }
 0x168   :  { %799 = vmatpush.bf16.msra.mxu1 %v2142_v45  ;;  %813 = vmatpush.bf16.msra.mxu2 %v1869_v36 }
 0x16c   :  { %800 = vmatpush.bf16.msra.mxu1 %v2143_v46  ;;  %814 = vmatpush.bf16.msra.mxu2 %v1875_v10 }
 0x170   :  { %801 = vmatpush.bf16.msra.mxu1 %v2144_v52  ;;  %815 = vmatpush.bf16.msra.mxu2 %v1881_v17 }
 0x174   :  { %802 = vmatpush.bf16.msra.mxu1 %v2145_v53  ;;  %816 = vmatpush.bf16.msra.mxu2 %v1891_v28 }
 0x178   :  { %803 = vmatpush.bf16.msra.mxu1 %v2146_v55  ;;  %817 = vmatpush.bf16.msra.mxu2 %v1897_v38 }
 0x17c   :  { %804 = vmatpush.bf16.msra.mxu1 %v2147_v61  ;;  %818 = vmatpush.bf16.msra.mxu2 %v1903_v48 }
 0x17f   :  { %805 = vmatmul.bf16.vlgmr.msra.gmra.mxu1 %v697_v1  ;;  %819 = vmatmul.bf16.vlgmr.msra.gmra.mxu2 %v697_v1 }
 0x19b   :  { %v576_v4 = vpop.f32.mrf.mxu1 }
 0x19c   :  { %v618_v3 = vpop.f32.mrf.mxu0 }
 0x1a1   :  { %v590_v9 = vpop.f32.mrf.mxu2 }
 0x1a2   :  { %v604_v22 = vpop.f32.mrf.mxu3 }
 0x1a3   :  { %v578_v32 = vpop.f32.mrf.mxu1 }
 0x1a4   :  { %v620_v30 = vpop.f32.mrf.mxu0 }
 0x1a9   :  { %v592_v31 = vpop.f32.mrf.mxu2 }
 0x1aa   :  { %v606_v33 = vpop.f32.mrf.mxu3 }
 0x1ab   :  { %v632_v27 = vpop.f32.mrf.mxu1 }
 0x1ac   :  { %v1962_v40 = vpop.f32.mrf.mxu0 }
 0x1b1   :  { %v646_v54 = vpop.f32.mrf.mxu2 }
 0x1b2   :  { %v660_v63 = vpop.f32.mrf.mxu3 }
 0x1b3   :  { %v634_v43 = vpop.f32.mrf.mxu1 }
 0x1b4   :  { %v1965_v42 = vpop.f32.mrf.mxu0 }
 0x1b9   :  { %v648_v56 = vpop.f32.mrf.mxu2 }
 0x1ba   :  { %v662_v2 = vpop.f32.mrf.mxu3 }
 0x1bc   :  { %v688_v12 = vpop.f32.mrf.mxu1 }
 0x1bf   :  { %v736_v59 = vpop.f32.mrf.mxu0 }
 0x1c0   :  { %v1968_v60 = vadd.f32 %v736_v59, %v604_v22 }
 0x1c2   :  { %v708_v57 = vpop.f32.mrf.mxu2 }
 0x1c3   :  { %v1970_v50 = vadd.f32 %v708_v57, %v576_v4 }
 0x1c4   :  { %v1974_v14 = vpop.f32.mrf.mxu1 }
 0x1c5   :  { %v722_v18 = vpop.f32.mrf.mxu3 }
 0x1c6   :  { %v1972_v35 = vadd.f32 %v722_v18, %v590_v9  ;;  %v896_v18 = vstv %s1992_s18 }
 0x1c7   :  { %v738_v0 = vpop.f32.mrf.mxu0 }
 0x1c8   :  { %v739_v48 = vadd.f32 %v738_v0, %v606_v33 }
 0x1ca   :  { %v710_v51 = vpop.f32.mrf.mxu2  ;;  %v829_v25 = vrot.slane %v739_v48, 6  ;;  %v863_v34 = vrot.slane %v739_v48, 7 }
 0x1cb   :  { %v711_v26 = vadd.f32 %v710_v51, %v578_v32 }
 0x1cd   :  { %v724_v21 = vpop.f32.mrf.mxu3  ;;  %v861_v38 = vrot.slane %v711_v26, 1 }
 0x1ce   :  { %v725_v29 = vadd.f32 %v724_v21, %v592_v31 }
 0x1d0   :  { %v826_v39 = vrot.slane %v725_v29, 7  ;;  %v878_v1 = vsel %vm846_vm1, %v861_v38, %v725_v29  ;;  %v918_v38 = vstv %s2005_s22 }
 0x1d1   :  { %v879_v52 = vsel %vm848_vm2, %v878_v1, %v863_v34 }
 0x1d2   :  { %v847_v7 = vsel %vm846_vm1, %v711_v26, %v826_v39 }
 0x1d3   :  { %v849_v53 = vsel %vm848_vm2, %v847_v7, %v829_v25  ;;  %v1405_v25 = vld [vmem:[%s2100_s5 + $0x10] sm:$0xff] }
 0x1dc   :  { %v750_v36 = vpop.f32.mrf.mxu1 }
 0x1dd   :  { %v1976_v44 = vadd.f32 %v750_v36, %v618_v3 }
 0x1de   :  { %v792_v6 = vpop.f32.mrf.mxu0 }
 0x1df   :  { %v1978_v10 = vadd.f32 %v792_v6, %v660_v63 }
 0x1e2   :  { %v764_v11 = vpop.f32.mrf.mxu2 }
 0x1e3   :  { %v1980_v16 = vadd.f32 %v764_v11, %v632_v27  ;;  %v901_v11 = vstv %s1994_s19 }
 0x1e4   :  { %v778_v17 = vpop.f32.mrf.mxu3  ;;  %v752_v28 = vpop.f32.mrf.mxu1 }
 0x1e5   :  { %v1982_v20 = vadd.f32 %v778_v17, %v646_v54  ;;  %v753_v47 = vadd.f32 %v752_v28, %v620_v30  ;;  %v904_v17 = vstv %s2000_s20 }
 0x1e6   :  { %v794_v46 = vpop.f32.mrf.mxu0 }
 0x1e7   :  { %v832_v15 = vrot.slane %v753_v47, 5  ;;  %v865_v19 = vrot.slane %v753_v47, 6  ;;  %v795_v9 = vadd.f32 %v794_v46, %v662_v2 }
 0x1e9   :  { %v851_v55 = vsel %vm850_vm3, %v849_v53, %v832_v15  ;;  %v880_v61 = vsel %vm850_vm3, %v879_v52, %v865_v19  ;;  %v841_v24 = vrot.slane %v795_v9, 2  ;;  %v871_v27 = vrot.slane %v795_v9, 3  ;;  %v1406_v9 = vld [vmem:[%s2100_s5 + $0x18] sm:$0x1] }
 0x1ea   :  { %v766_v37 = vpop.f32.mrf.mxu2 }
 0x1eb   :  { %v767_v49 = vadd.f32 %v766_v37, %v634_v43  ;;  %v885_v43 = vperm.slane %v1844_v58, 2  ;;  %v915_v58 = vstv %s2002_s21 }
 0x1ec   :  { %v780_v62 = vpop.f32.mrf.mxu3 }
 0x1ed   :  { %v781_v23 = vadd.f32 %v780_v62, %v648_v56  ;;  %v835_v41 = vrot.slane %v767_v49, 4  ;;  %v867_v45 = vrot.slane %v767_v49, 5 }
 0x1ef   :  { %v838_v3 = vrot.slane %v781_v23, 3  ;;  %v869_v4 = vrot.slane %v781_v23, 4  ;;  %v853_v30 = vsel %vm852_vm4, %v851_v55, %v835_v41  ;;  %v881_v31 = vsel %vm852_vm4, %v880_v61, %v867_v45  ;;  %v909_v23 = vld [vmem:[%s2100_s5] sm:$0xff] }
 0x1f1   :  { %v855_v63 = vsel %vm854_vm5, %v853_v30, %v838_v3  ;;  %v882_v13 = vsel %vm854_vm5, %v881_v31, %v869_v4  ;;  %v910_v4 = vld [vmem:[%s2100_s5 + $0x8] sm:$0x1]  ;;  %v930_v31 = vstv %s2016_s23 }
 0x1f2   :  { %v857_v59 = vsel %vm856_vm6, %v855_v63, %v841_v24  ;;  %v883_v57 = vsel %vm856_vm6, %v882_v13, %v871_v27  ;;  %v938_v27 = vstv %s2020_s25 }
 0x1fc   :  { %v1985_v5 = vpop.f32.mrf.mxu1 }
 0x202   :  { %v820_v22 = vpop.f32.mrf.mxu2 }
 0x203   :  { %v1998_v32 = vadd.f32 %v820_v22, %v688_v12 }
 0x204   :  { %v808_v33 = vpop.f32.mrf.mxu1 }
 0x205   :  { %v809_v54 = vadd.f32 %v808_v33, %v1965_v42  ;;  %v888_v42 = vstv %s1988_s2  ;;  %v933_v33 = vstv %s2018_s24 }
 0x207   :  { %v844_v56 = vrot.slane %v809_v54, 1  ;;  %v873_v2 = vrot.slane %v809_v54, 2 }
 0x209   :  { %v859_v12 = vsel %vm858_vm7, %v857_v59, %v844_v56  ;;  %v884_v0 = vsel %vm858_vm7, %v883_v57, %v873_v2  ;;  %v941_v56 = vstv %s2022_s26 }
 0x20a   :  { %v822_v51 = vpop.f32.mrf.mxu2  ;;  %v886_v21 = vsub.f32 %v885_v43, %v859_v12  ;;  %v894_v36 = vsub.f32 %v893_v8, %v884_v0 }
 0x20b   :  { %v823_v6 = vadd.f32 %v822_v51, %v1974_v14 }
 0x20c   :  { %v889_v26 = vadd.f32 %v888_v42, %v886_v21  ;;  %v897_v28 = vadd.f32 %v896_v18, %v894_v36 }
 0x20d   :  { %v876_v29 = vrot.slane %v823_v6, 1  ;;  %v887_v37 = vsub.f32 %v885_v43, %v823_v6 }
 0x20e   :  { %v891_v39 = vmax.f32 %v889_v26, 0.0  ;;  %v899_v47 = vmax.f32 %v897_v28, 0.0 }
 0x20f   :  { %v890_v48 = vadd.f32 %v888_v42, %v887_v37  ;;  %v895_v49 = vsub.f32 %v893_v8, %v876_v29 }
 0x210   :  { %v902_v62 = vmul.f32 %v901_v11, %v891_v39  ;;  %v905_v14 = vmul.f32 %v904_v17, %v899_v47  ;;  %v916_v1 = vmul.f32 %v915_v58, %v891_v39  ;;  %v919_v7 = vmul.f32 %v918_v38, %v899_v47 }
 0x211   :  { %v892_v15 = vmax.f32 %v890_v48, 0.0  ;;  %v898_v19 = vadd.f32 %v896_v18, %v895_v49 }
 0x212   :  { %v907_v34 = vadd.f32 %v905_v14, %v902_v62  ;;  %v921_v41 = vadd.f32 %v919_v7, %v916_v1 }
 0x213   :  { %v900_v45 = vmax.f32 %v898_v19, 0.0  ;;  %v903_v53 = vmul.f32 %v901_v11, %v892_v15  ;;  %v917_v61 = vmul.f32 %v915_v58, %v892_v15 }
 0x214   :  { %v911_v46 = vadd.f32 %v909_v23, %v907_v34  ;;  %v926_v52 = vadd.f32 %v1405_v25, %v921_v41 }
 0x215   :  { %v906_v55 = vmul.f32 %v904_v17, %v900_v45  ;;  %v920_v3 = vmul.f32 %v918_v38, %v900_v45 }
 0x216   :  { %v913_v54 = vmax.f32 %v911_v46, 0.0  ;;  %v928_v63 = vmax.f32 %v926_v52, 0.0 }
 0x217   :  { %v908_v22 = vadd.f32 %v906_v55, %v903_v53  ;;  %v922_v30 = vadd.f32 %v920_v3, %v917_v61 }
 0x218   :  { %v931_v43 = vmul.f32 %v930_v31, %v913_v54  ;;  %v934_v59 = vmul.f32 %v933_v33, %v928_v63  ;;  %v939_v57 = vmul.f32 %v938_v27, %v913_v54  ;;  %v942_v42 = vmul.f32 %v941_v56, %v928_v63 }
 0x219   :  { %v912_v13 = vadd.f32 %v910_v4, %v908_v22  ;;  %v927_v24 = vadd.f32 %v1406_v9, %v922_v30 }
 0x21a   :  { %v936_v6 = vadd.f32 %v934_v59, %v931_v43  ;;  %v944_v11 = vadd.f32 %v942_v42, %v939_v57 }
 0x21b   :  { %v914_v2 = vmax.f32 %v912_v13, 0.0  ;;  %v929_v8 = vmax.f32 %v927_v24, 0.0 }
 0x21d   :  { %v932_v18 = vmul.f32 %v930_v31, %v914_v2  ;;  %v935_v12 = vmul.f32 %v933_v33, %v929_v8  ;;  %v940_v0 = vmul.f32 %v938_v27, %v914_v2  ;;  %v943_v51 = vmul.f32 %v941_v56, %v929_v8 }
 0x21f   :  { %v937_v21 = vadd.f32 %v935_v12, %v932_v18  ;;  %v945_v36 = vadd.f32 %v943_v51, %v940_v0  ;;  %v807_v18 = vadd.f32 %v1985_v5, %v1962_v40 }
 0x221   :  { %v946_v17 = vsel %vm846_vm1, %v937_v21, -inf  ;;  %v960_v26 = vsel %vm846_vm1, %v945_v36, -inf }
 0x222   :  { %v947_v28 = vmax.f32 %v936_v6, %v946_v17  ;;  %v961_v29 = vmax.f32 %v944_v11, %v960_v26 }
 0x224   :  { %v948_v37 = vrot.slane %v947_v28, 4  ;;  %v962_v58 = vrot.slane %v961_v29, 4 }
 0x226   :  { %v949_v38 = vmax.f32 %v947_v28, %v948_v37  ;;  %v963_v39 = vmax.f32 %v961_v29, %v962_v58 }
 0x228   :  { %v950_v47 = vrot.slane %v949_v38, 2  ;;  %v964_v48 = vrot.slane %v963_v39, 2 }
 0x22a   :  { %v951_v49 = vmax.f32 %v949_v38, %v950_v47  ;;  %v965_v62 = vmax.f32 %v963_v39, %v964_v48 }
 0x22c   :  { %v952_v14 = vrot.slane %v951_v49, 1  ;;  %v966_v1 = vrot.slane %v965_v62, 1 }
 0x22e   :  { %v953_v7 = vmax.f32 %v951_v49, %v952_v14  ;;  %v967_v15 = vmax.f32 %v965_v62, %v966_v1 }
 0x230   :  { %v954_v19 = vsub.f32 %v936_v6, %v953_v7  ;;  %v955_v23 = vsub.f32 %v937_v21, %v953_v7  ;;  %v968_v25 = vsub.f32 %v944_v11, %v967_v15  ;;  %v969_v34 = vsub.f32 %v945_v36, %v967_v15 }
 0x232   :  { %v956_v41 = vmul.f32 1.442695, %v954_v19  ;;  %v958_v45 = vmul.f32 1.442695, %v955_v23  ;;  %v970_v46 = vmul.f32 1.442695, %v968_v25 }
 0x233   :  { %v972_v52 = vmul.f32 1.442695, %v969_v34 }
 0x234   :  { %1496 = vpow2.f32 %v956_v41 }
 0x235   :  { %1498 = vpow2.f32 %v958_v45 }
 0x236   :  { %1500 = vpow2.f32 %v970_v46 }
 0x237   :  { %1502 = vpow2.f32 %v972_v52 }
 0x23a   :  { %v1497_v53 = vpop.eup %1496 }
 0x23b   :  { %v2042_v55 = vpop.eup %1498  ;;  %v992_v61 = vperm.slane %v1497_v53, 0  ;;  %v996_v3 = vperm.slane %v1497_v53, 1  ;;  %v1002_v4 = vperm.slane %v1497_v53, 2  ;;  %v1008_v30 = vperm.slane %v1497_v53, 3 }
 0x23c   :  { %v2044_v9 = vpop.eup %1500  ;;  %v974_v22 = vsel %vm846_vm1, %v2042_v55, 0.0  ;;  %v1014_v31 = vperm.slane %v1497_v53, 4  ;;  %v1020_v51 = vperm.slane %v1497_v53, 5  ;;  %v1032_v7 = vperm.slane %v1497_v53, 7 }
 0x23d   :  { %v2048_v33 = vpop.eup %1502  ;;  %v975_v54 = vadd.f32 %v1497_v53, %v974_v22  ;;  %v993_v63 = vmul.f32 %v992_v61, %v1970_v50  ;;  %v994_v13 = vperm.slane %v2044_v9, 0  ;;  %v997_v24 = vmul.f32 %v996_v3, %v1972_v35 }
 0x23e   :  { %v983_v27 = vsel %vm846_vm1, %v2048_v33, 0.0  ;;  %v999_v56 = vperm.slane %v2044_v9, 1  ;;  %v1003_v2 = vmul.f32 %v1002_v4, %v1968_v60  ;;  %v1005_v8 = vperm.slane %v2044_v9, 2 }
 0x23f   :  { %v976_v43 = vrot.slane %v975_v54, 4  ;;  %v984_v59 = vadd.f32 %v2044_v9, %v983_v27  ;;  %v995_v57 = vmul.f32 %v994_v13, %v1970_v50  ;;  %v998_v42 = vadd.f32 %v997_v24, %v993_v63 }
 0x240   :  { %v1000_v12 = vmul.f32 %v999_v56, %v1972_v35  ;;  %v1011_v0 = vperm.slane %v2044_v9, 3  ;;  %v1009_v11 = vmul.f32 %v1008_v30, %v1976_v44  ;;  %v1006_v26 = vmul.f32 %v1005_v8, %v1968_v60 }
 0x241   :  { %v977_v21 = vadd.f32 %v976_v43, %v975_v54  ;;  %v985_v36 = vrot.slane %v984_v59, 4  ;;  %v1004_v6 = vadd.f32 %v1003_v2, %v998_v42  ;;  %v1017_v28 = vperm.slane %v2044_v9, 4  ;;  %v1508_v54 = vld [vmem:[%s2099_s4] sm:$0xff]  ;;  %s1585_s4 = smov [#allocation7]  }
 0x242   :  { %v1001_v17 = vadd.f32 %v1000_v12, %v995_v57  ;;  %v1026_v50 = vperm.slane %v1497_v53, 6  ;;  %v1015_v40 = vmul.f32 %v1014_v31, %v1980_v16  ;;  %v1012_v5 = vmul.f32 %v1011_v0, %v1976_v44  ;;  %s1093_s13 = sshll.u32 %s1585_s4, 4  ;;  %s1094_s13 = int_to_ptr.vmem [resolvable:$true] %s1093_s13 }
 0x243   :  { %v978_v29 = vrot.slane %v977_v21, 2  ;;  %v986_v37 = vadd.f32 %v985_v36, %v984_v59  ;;  %v1010_v58 = vadd.f32 %v1009_v11, %v1004_v6  ;;  %v1021_v38 = vmul.f32 %v1020_v51, %v1982_v20  ;;  %v1509_v51 = vld [vmem:[%s2095_s0] sm:$0xff] }
 0x244   :  { %v1007_v35 = vadd.f32 %v1006_v26, %v1001_v17  ;;  %v1023_v39 = vperm.slane %v2044_v9, 5  ;;  %v1018_v60 = vmul.f32 %v1017_v28, %v1980_v16  ;;  %v1027_v14 = vmul.f32 %v1026_v50, %v1978_v10 }
 0x245   :  { %v979_v47 = vadd.f32 %v978_v29, %v977_v21  ;;  %v987_v48 = vrot.slane %v986_v37, 2  ;;  %v1016_v49 = vadd.f32 %v1015_v40, %v1010_v58  ;;  %v1029_v1 = vperm.slane %v2044_v9, 6 }
 0x246   :  { %v1013_v62 = vadd.f32 %v1012_v5, %v1007_v35  ;;  %v1038_v44 = vperm.slane %v2042_v55, 0  ;;  %v1024_v34 = vmul.f32 %v1023_v39, %v1982_v20  ;;  %v1035_v41 = vperm.slane %v2044_v9, 7  ;;  %v1049_v20 = vpop.permute.xlu1 %1048 }
 0x247   :  { %v980_v15 = vrot.slane %v979_v47, 1  ;;  %v988_v19 = vadd.f32 %v987_v48, %v986_v37  ;;  %v1022_v23 = vadd.f32 %v1021_v38, %v1016_v49  ;;  %v1033_v16 = vmul.f32 %v1032_v7, %v807_v18 }
 0x248   :  { %v1019_v25 = vadd.f32 %v1018_v60, %v1013_v62  ;;  %v1030_v3 = vmul.f32 %v1029_v1, %v1978_v10  ;;  %v1041_v4 = vperm.slane %v2048_v33, 0  ;;  %v1039_v30 = vmul.f32 %v1038_v44, %v1998_v32 }
 0x249   :  { %v981_v45 = vadd.f32 %v980_v15, %v979_v47  ;;  %v989_v46 = vrot.slane %v988_v19, 1  ;;  %v1028_v52 = vadd.f32 %v1027_v14, %v1022_v23  ;;  %v1584_v55 = vmov 4  }
 0x24a   :  { %v1025_v61 = vadd.f32 %v1024_v34, %v1019_v25  ;;  %1494 = vset.pattern.permute.xlu2 %v1584_v55  ;;  %1495 = vset.pattern.permute.xlu0 %v1584_v55  ;;  %v1036_v9 = vmul.f32 %v1035_v41, %v807_v18  ;;  %v1042_v33 = vmul.f32 %v1041_v4, %v1998_v32  ;;  %v1058_v18 = vld [vmem:[%s2098_s3] sm:$0xff] }
 0x24b   :  { %1504 = vrcp.f32 %v981_v45  ;;  %v990_v53 = vadd.f32 %v989_v46, %v988_v19  ;;  %v1034_v22 = vadd.f32 %v1033_v16, %v1028_v52  ;;  %1060 = vperm.xlu2 %1494, %v1508_v54  }
 0x24c   :  { %v1031_v31 = vadd.f32 %v1030_v3, %v1025_v61 }
 0x24d   :  { %1506 = vrcp.f32 %v990_v53  ;;  %v1040_v10 = vadd.f32 %v1039_v30, %v1034_v22 }
 0x24e   :  { %v1037_v63 = vadd.f32 %v1036_v9, %v1031_v31  ;;  %v1054_v43 = vpop.permute.xlu1 %1053 }
 0x250   :  { %v1043_v13 = vadd.f32 %v1042_v33, %v1037_v63 }
 0x251   :  { %v1505_v24 = vpop.eup %1504 }
 0x252   :  { %v1044_v27 = vmul.f32 %v1505_v24, %v1040_v10 }
 0x253   :  { %v1507_v56 = vpop.eup %1506 }
 0x254   :  { %v1045_v2 = vmul.f32 %v1507_v56, %v1043_v13 }
 0x256   :  { %v1046_v8 = vsel %vm852_vm4, %v1044_v27, %v1045_v2 }
 0x257   :  { %v1051_v59 = vmul.f32 %v1049_v20, %v1046_v8 }
 0x259   :  { %v1056_v57 = vadd.f32 %v1054_v43, %v1051_v59 }
 0x25b   :  { %v1057_v42 = vmax.f32 %v1056_v57, 0.0 }
 0x25d   :  { %1081 = vmatpush.msra.mxu3 %v1057_v42 }
 0x25e   :  { %1407 = vmatmul.msk.f32.vlgmr.msra.gmra.mxu3 %vm82_vm0, %v1058_v18 }
 0x2a5   :  { %v1061_v12 = vpop.permute.xlu2 %1060 }
 0x2e1   :  { %v1083_v32 = vpop.f32.mrf.mxu3 }
 0x2e2   :  { %v1084_v0 = vadd.f32 %v1083_v32, %v1061_v12 }
 0x2e4   :  { %v1086_v21 = vadd.f32 %v1509_v51, %v1084_v0 }
 0x2e6   :  { %1087 = vst [vmem:[#allocation7] sm:$0xff] %v1086_v21 }
 0x2e7   :  { %1098 = dma.vmem_to_hbm [thread:$0]  %s1094_s13, 128, %s1096_s16, [#allocation4]  }
 0x2e8   :  { %1574 = dma.done.wait [#allocation4], 128  }
 0x2e9   :  { %1575 = vsyncadd [#allocation4], 4294967168 }
 0x2ea   :  { %1103 = vsyncpa [#allocation3], 1 }
 0x2eb   :  { %1104 = vsyncpa [#allocation4], 1 }
 0x2ec   :  { %1105 = vsyncpa [#allocation5], 1 }

</bundles_post_ra>
